<compile_context>
chip_gen: v5e
topology: v5e:2x2
jax: 0.10.0
libtpu: 0.0.40
codegen_flags: <defaults>
</compile_context>

<pallas_src>
import functools

import numpy as np
import jax
import jax.numpy as jnp
from jax.experimental import pallas as pl
from jax.experimental.pallas import tpu as pltpu


def _round_up(x, m):
    return (x + m - 1) // m * m


# ----------------------------------------------------------------------------
# Fused conv-as-GEMM Pallas kernel.
#   x_ref : (R, Cp)        f32, flattened (padded-spatial) activation, VMEM-resident
#   w_ref : (taps, Cp, TN) bf16, BN scale already folded into columns
#   b_ref : (1, TN)        f32 per-channel shift
#   o_ref : (TM, TN)       output tile
# ----------------------------------------------------------------------------
def _conv_kernel(x_ref, w_ref, b_ref, o_ref, *, taps_off, head, tm, relu):
    i = pl.program_id(1)
    big = tm + 2 * head
    base = pl.multiple_of(i * tm, 8)                 # aligned dynamic row start
    a_big = x_ref[pl.ds(base, big), :]               # (big, Cp) f32

    acc = None
    for t, off in enumerate(taps_off):               # static tap offsets
        a = a_big[head + off: head + off + tm, :].astype(jnp.bfloat16)
        part = jnp.dot(a, w_ref[t], preferred_element_type=jnp.float32)
        acc = part if acc is None else acc + part

    acc = acc + b_ref[...]
    if relu:
        acc = jnp.maximum(acc, 0.0)
    o_ref[...] = acc.astype(o_ref.dtype)


def _conv_gemm(xf, w, shift, *, taps_off, head, relu, out_dtype=jnp.float32):
    """y[r, :] = relu(sum_t x[r + off_t, :] @ w[t] + shift), r in [0, M)."""
    M, cp = xf.shape
    taps, cpw, coutp = w.shape
    assert cpw == cp and taps == len(taps_off)

    TM = min(_round_up(M, 8), 512)
    Mp = _round_up(M, TM)
    HEAD = _round_up(head, 8) if head > 0 else 0
    if coutp <= 128:
        TN = coutp
    elif coutp <= 256:
        TN = 128          # >=2 parallel N blocks for weight-bound layers
    else:
        TN = 256
    n_j, n_i = coutp // TN, Mp // TM
    R = Mp + 2 * HEAD

    xfp = jnp.pad(xf.astype(jnp.float32), ((HEAD, HEAD + Mp - M), (0, 0)))

    kern = functools.partial(_conv_kernel, taps_off=tuple(taps_off),
                             head=HEAD, tm=TM, relu=relu)
    return pl.pallas_call(
        kern,
        out_shape=jax.ShapeDtypeStruct((Mp, coutp), out_dtype),
        grid=(n_j, n_i),
        in_specs=[
            pl.BlockSpec((R, cp), lambda j, i: (0, 0)),          # whole activation
            pl.BlockSpec((taps, cp, TN), lambda j, i: (0, 0, j)),  # weight slab
            pl.BlockSpec((1, TN), lambda j, i: (0, j)),           # shift
        ],
        out_specs=pl.BlockSpec((TM, TN), lambda j, i: (i, j)),
        compiler_params=pltpu.CompilerParams(
            dimension_semantics=("parallel", "parallel"),
            vmem_limit_bytes=32 * 1024 * 1024),
    )(xfp, w, shift)


# ----------------------------------------------------------------------------
# Conv wrappers (NHWC).
# ----------------------------------------------------------------------------
def conv3x3(x, p, *, relu, input_padded=False, return_padded=False,
            out_dtype=jnp.float32):
    """3x3 'same' conv (+folded BN shift, +optional ReLU).

    input_padded : x is already (N, H+2, W+2, Cp), zero border, channel padded.
    return_padded: return (N, H+2, W+2, Coutp) with zero border/channels, ready
                   to feed the next conv3x3 with input_padded=True.
    """
    w, shift, cout = p["w"], p["shift"], p["cout"]
    _, cp, coutp = w.shape

    if input_padded:
        N, Hp, Wp, cx = x.shape
        assert cx == cp, (cx, cp)
        xp = x
    else:
        N, H, W, cx = x.shape
        Hp, Wp = H + 2, W + 2
        assert cx <= cp
        xp = jnp.pad(x, ((0, 0), (1, 1), (1, 1), (0, cp - cx)))
    H, W = Hp - 2, Wp - 2

    taps_off = tuple((ky - 1) * Wp + (kx - 1)
                     for ky in range(3) for kx in range(3))
    M = N * Hp * Wp
    y = _conv_gemm(xp.reshape(M, cp), w, shift, taps_off=taps_off,
                   head=Wp + 1, relu=relu, out_dtype=out_dtype)
    y = y[:M].reshape(N, Hp, Wp, coutp)

    if return_padded:
        mask = np.zeros((1, Hp, Wp, 1), np.float32)
        mask[:, 1:H + 1, 1:W + 1, :] = 1.0
        return y * jnp.asarray(mask, dtype=y.dtype)
    return y[:, 1:H + 1, 1:W + 1, :cout]


def conv1x1(x, p, *, relu=False, out_dtype=jnp.float32):
    w, shift, cout = p["w"], p["shift"], p["cout"]
    _, cp, coutp = w.shape
    N, H, W, cx = x.shape
    xf = jnp.pad(x, ((0, 0), (0, 0), (0, 0), (0, cp - cx))).reshape(N * H * W, cp)
    y = _conv_gemm(xf, w, shift, taps_off=(0,), head=0, relu=relu,
                   out_dtype=out_dtype)
    return y[:N * H * W, :cout].reshape(N, H, W, cout)


# ----------------------------------------------------------------------------
# Bilinear 2x upsample (align_corners=True) as a small Pallas kernel.
# ----------------------------------------------------------------------------
def _interp_taps(n_in):
    n_out = 2 * n_in
    taps = []
    for o in range(n_out):
        pos = 0.0 if n_out <= 1 else o * (n_in - 1) / (n_out - 1)
        i0 = min(int(np.floor(pos)), n_in - 1)
        f = float(pos - i0)
        i1 = min(i0 + 1, n_in - 1)
        taps.append((i0, i1, f))
    return taps


def upsample2x(x):
    """(N, H, W, C) -> (N, 2H, 2W, C), bilinear, align_corners=True (PyTorch)."""
    N, H, W, C = x.shape
    h_taps = _interp_taps(H)
    w_taps = _interp_taps(W)

    Wpad = max(128, _round_up(W, 8))
    MW8 = _round_up(2 * W, 8)
    mw_np = np.zeros((MW8, Wpad), np.float32)
    for o, (i0, i1, f) in enumerate(w_taps):
        mw_np[o, i0] += 1.0 - f
        mw_np[o, i1] += f
    mw = jnp.asarray(mw_np)

    xp = jnp.pad(x.astype(jnp.float32),
                 ((0, 0), (0, 0), (0, Wpad - W), (0, 0))).reshape(N * H, Wpad, C)

    def kernel(x_ref, mw_ref, o_ref):
        mwv = mw_ref[...]
        for n in range(N):
            for oh, (i0, i1, f) in enumerate(h_taps):
                r0 = x_ref[n * H + i0]                        # (Wpad, C)
                if i1 == i0 or f == 0.0:
                    row = r0
                else:
                    row = r0 * (1.0 - f) + x_ref[n * H + i1] * f
                out = jnp.dot(mwv, row, preferred_element_type=jnp.float32)
                o_ref[n * 2 * H + oh] = out[:2 * W, :]

    y = pl.pallas_call(
        kernel,
        out_shape=jax.ShapeDtypeStruct((N * 2 * H, 2 * W, C), jnp.float32),
        grid=(1,),
        in_specs=[
            pl.BlockSpec((N * H, Wpad, C), lambda i: (0, 0, 0)),
            pl.BlockSpec((MW8, Wpad), lambda i: (0, 0)),
        ],
        out_specs=pl.BlockSpec((N * 2 * H, 2 * W, C), lambda i: (0, 0, 0)),
        compiler_params=pltpu.CompilerParams(vmem_limit_bytes=32 * 1024 * 1024),
    )(xp, mw)
    return y.reshape(N, 2 * H, 2 * W, C)


# ----------------------------------------------------------------------------
# Deterministic parameter construction (synthetic, mirrors module shapes).
# BN (eval mode) scale is folded into the weight columns; only the shift stays.
# ----------------------------------------------------------------------------
def _pack_conv(w_taps, shift, cout):
    """w_taps: (taps, cin, cout) f32 (scale folded); shift: (cout,) f32."""
    taps, cin, cout_ = w_taps.shape
    cp, coutp = _round_up(cin, 128), _round_up(cout_, 128)
    w = jnp.pad(w_taps, ((0, 0), (0, cp - cin), (0, coutp - cout_)))
    w = w.astype(jnp.bfloat16)
    sh = jnp.pad(shift.astype(jnp.float32), (0, coutp - cout_)).reshape(1, coutp)
    return {"w": w, "shift": sh, "cout": cout_}


def _conv_bn_params(key, cin, cout):
    k1, k2, k3, k4, k5, k6 = jax.random.split(key, 6)
    w = jax.random.normal(k1, (3, 3, cin, cout), jnp.float32) / np.sqrt(9.0 * cin)
    b = 0.1 * jax.random.normal(k2, (cout,), jnp.float32)
    gamma = 1.0 + 0.1 * jax.random.normal(k3, (cout,), jnp.float32)
    beta = 0.1 * jax.random.normal(k4, (cout,), jnp.float32)
    run_mean = 0.1 * jax.random.normal(k5, (cout,), jnp.float32)
    run_var = 1.0 + 0.1 * jnp.abs(jax.random.normal(k6, (cout,), jnp.float32))
    eps = 1e-5
    scale = gamma / jnp.sqrt(run_var + eps)
    shift = beta + scale * (b - run_mean)
    w_folded = (w * scale[None, None, None, :]).reshape(9, cin, cout)
    return _pack_conv(w_folded, shift, cout)


def _conv_params(key, cin, cout, ksize):
    k1, k2 = jax.random.split(key, 2)
    w = jax.random.normal(k1, (ksize, ksize, cin, cout), jnp.float32)
    w = w / np.sqrt(ksize * ksize * cin)
    b = 0.1 * jax.random.normal(k2, (cout,), jnp.float32)
    return _pack_conv(w.reshape(ksize * ksize, cin, cout), b, cout)


def make_params(key, n_classes):
    keys = jax.random.split(key, 14)
    p = {"init": _conv_bn_params(keys[0], 1024, 512)}
    up_channels = [(1024, 256), (512, 128), (256, 64), (128, 32), (64, 32)]
    for i, (cin, cout) in enumerate(up_channels, start=1):
        p[f"up{i}_c1"] = _conv_bn_params(keys[2 * i - 1], cin, cout)
        p[f"up{i}_c2"] = _conv_bn_params(keys[2 * i], cout, cout)
    p["conv"] = _conv_params(keys[11], 32, 32, 3)
    p["final"] = _conv_params(keys[12], 32, n_classes, 1)
    return p


# ----------------------------------------------------------------------------
# Full UNetDecoder forward (inputs/outputs NCHW, like the PyTorch module).
# ----------------------------------------------------------------------------
def unet_decoder_forward(features_nchw, params):
    feats = [jnp.transpose(f, (0, 2, 3, 1)).astype(jnp.float32)
             for f in features_nchw]
    f1, f2, f3, f4, f5, f6 = feats

    x = conv3x3(f6, params["init"], relu=True)

    def up_block(x, skip, p1, p2):
        xu = upsample2x(x)
        xc = jnp.concatenate([skip, xu], axis=-1)     # torch.cat([x2, x1], dim=1)
        y = conv3x3(xc, p1, relu=True, return_padded=True)
        y = conv3x3(y, p2, relu=True, input_padded=True)
        return y

    x = up_block(x, f5, params["up1_c1"], params["up1_c2"])
    x = up_block(x, f4, params["up2_c1"], params["up2_c2"])
    x = up_block(x, f3, params["up3_c1"], params["up3_c2"])
    x = up_block(x, f2, params["up4_c1"], params["up4_c2"])
    x = up_block(x, f1, params["up5_c1"], params["up5_c2"])

    x = conv3x3(x, params["conv"], relu=False)        # plain conv, no BN/ReLU
    x = conv1x1(x, params["final"], relu=False)       # 1x1 final conv
    return jnp.transpose(x, (0, 3, 1, 2))             # back to NCHW


# ----------------------------------------------------------------------------
# Small numerical self-tests for the building blocks (loose bf16 tolerances).
# ----------------------------------------------------------------------------
def _ref_conv3x3(x, w_hwio, b, relu):
    y = jax.lax.conv_general_dilated(
        x, w_hwio, window_strides=(1, 1), padding="SAME",
        dimension_numbers=("NHWC", "HWIO", "NHWC"),
        precision=jax.lax.Precision.HIGHEST)
    y = y + b
    return jnp.maximum(y, 0.0) if relu else y


def _selftest(key):
    k1, k2, k3, k4, k5 = jax.random.split(key, 5)
    N, H, W, cin, cmid, cout = 2, 5, 7, 24, 16, 8
    x = jax.random.normal(k1, (N, H, W, cin), jnp.float32)

    # chained 3x3 convs (covers padded-in/padded-out modes)
    w1 = jax.random.normal(k2, (3, 3, cin, cmid), jnp.float32) / np.sqrt(9 * cin)
    b1 = 0.1 * jax.random.normal(k2, (cmid,), jnp.float32)
    w2 = jax.random.normal(k3, (3, 3, cmid, cout), jnp.float32) / np.sqrt(9 * cmid)
    b2 = 0.1 * jax.random.normal(k3, (cout,), jnp.float32)
    p1 = _pack_conv(w1.reshape(9, cin, cmid), b1, cmid)
    p2 = _pack_conv(w2.reshape(9, cmid, cout), b2, cout)
    ya = conv3x3(x, p1, relu=True, return_padded=True)
    yb = conv3x3(ya, p2, relu=False, input_padded=True)
    w1q = p1["w"][:, :cin, :cmid].astype(jnp.float32).reshape(3, 3, cin, cmid)
    w2q = p2["w"][:, :cmid, :cout].astype(jnp.float32).reshape(3, 3, cmid, cout)
    ref = _ref_conv3x3(_ref_conv3x3(x, w1q, b1, True), w2q, b2, False)
    np.testing.assert_allclose(np.asarray(yb), np.asarray(ref),
                               atol=0.06, rtol=0.06)

    # 1x1 conv
    w3 = jax.random.normal(k4, (1, 1, cin, cout), jnp.float32) / np.sqrt(cin)
    b3 = 0.1 * jax.random.normal(k4, (cout,), jnp.float32)
    p3 = _pack_conv(w3.reshape(1, cin, cout), b3, cout)
    y3 = conv1x1(x, p3)
    w3q = p3["w"][0, :cin, :cout].astype(jnp.float32)
    ref3 = jnp.einsum("nhwc,co->nhwo", x, w3q,
                      precision=jax.lax.Precision.HIGHEST) + b3
    np.testing.assert_allclose(np.asarray(y3), np.asarray(ref3),
                               atol=0.06, rtol=0.06)

    # bilinear 2x upsample
    xu = jax.random.normal(k5, (2, 3, 5, 12), jnp.float32)
    got = upsample2x(xu)

    def mat(n):
        m = np.zeros((2 * n, n), np.float32)
        for o, (i0, i1, f) in enumerate(_interp_taps(n)):
            m[o, i0] += 1.0 - f
            m[o, i1] += f
        return m

    ref_u = jnp.einsum("oh,nhwc->nowc", mat(3), xu,
                       precision=jax.lax.Precision.HIGHEST)
    ref_u = jnp.einsum("pw,nowc->nopc", mat(5), ref_u,
                       precision=jax.lax.Precision.HIGHEST)
    np.testing.assert_allclose(np.asarray(got), np.asarray(ref_u),
                               atol=0.02, rtol=0.02)


# ----------------------------------------------------------------------------
if __name__ == "__main__":
    n_classes = 3
    batch = 1
    key = jax.random.PRNGKey(0)
    kp, kf, kt = jax.random.split(key, 3)

    _selftest(kt)

    params = make_params(kp, n_classes)

    # Encoder features (NCHW), smallest-to-largest spatial as the forward implies.
    feat_shapes = [
        (batch, 32, 64, 64),    # f1
        (batch, 64, 32, 32),    # f2
        (batch, 128, 16, 16),   # f3
        (batch, 256, 8, 8),     # f4
        (batch, 512, 4, 4),     # f5
        (batch, 1024, 2, 2),    # f6
    ]
    fkeys = jax.random.split(kf, 6)
    features = [jax.random.normal(k, s, jnp.float32)
                for k, s in zip(fkeys, feat_shapes)]

    fwd = jax.jit(functools.partial(unet_decoder_forward, params=params))
    out = jax.block_until_ready(fwd(features))

    assert out.shape == (batch, n_classes, 64, 64), out.shape
    assert bool(jnp.all(jnp.isfinite(out)))
    print("KERNEL_OK")
</pallas_src>

<mosaic_0001>
module attributes {stable_mosaic.version = 11 : i64} {
  func.func @_conv_kernel(%arg0: i32, %arg1: i32, %arg2: memref<160x128xf32, #tpu.memory_space<vmem>>, %arg3: memref<9x128x128xbf16, #tpu.memory_space<vmem>>, %arg4: memref<1x128xf32, #tpu.memory_space<vmem>>, %arg5: memref<128x128xf32, #tpu.memory_space<vmem>>) attributes {dimension_semantics = [#tpu.dimension_semantics<parallel>, #tpu.dimension_semantics<parallel>], iteration_bounds = array<i64: 1, 1>, scalar_prefetch = 0 : i64, scratch_operands = 0 : i64, tpu.core_type = #tpu.core_type<tc>, window_params = [{pipeline_mode = #tpu.pipeline_mode<synchronous>, transform_indices = @transform_0, window_bounds = array<i64: 160, 128>}, {transform_indices = @transform_1, window_bounds = array<i64: 9, 128, 128>}, {transform_indices = @transform_2, window_bounds = array<i64: 1, 128>}, {transform_indices = @transform_3, window_bounds = array<i64: 128, 128>}]} {
    %c128_i32 = arith.constant 128 : i32
    %0 = arith.muli %arg1, %c128_i32 : i32
    %1 = tpu.assume_multiple %0, 8 : i32
    %2 = arith.index_cast %1 : i32 to index
    %c0 = arith.constant 0 : index
    %3 = vector.load %arg2[%2, %c0] : memref<160x128xf32, #tpu.memory_space<vmem>>, vector<160x128xf32>
    %4 = vector.extract_strided_slice %3 {offsets = [6, 0], sizes = [128, 128], strides = [1, 1]} : vector<160x128xf32> to vector<128x128xf32>
    %5 = arith.truncf %4 : vector<128x128xf32> to vector<128x128xbf16>
    %c0_0 = arith.constant 0 : index
    %c0_1 = arith.constant 0 : index
    %c0_2 = arith.constant 0 : index
    %6 = vector.load %arg3[%c0_0, %c0_1, %c0_2] : memref<9x128x128xbf16, #tpu.memory_space<vmem>>, vector<1x128x128xbf16>
    %7 = vector.shape_cast %6 : vector<1x128x128xbf16> to vector<128x128xbf16>
    %cst = arith.constant dense<0.000000e+00> : vector<128x128xf32>
    %8 = tpu.matmul %5, %7, %cst {dimension_numbers = #tpu.dot_dimension_numbers<[1], [0], [0], [1], [0, 0, 1, 1], [], []>} : vector<128x128xbf16>, vector<128x128xbf16>, vector<128x128xf32> -> vector<128x128xf32>
    %9 = vector.extract_strided_slice %3 {offsets = [7, 0], sizes = [128, 128], strides = [1, 1]} : vector<160x128xf32> to vector<128x128xf32>
    %10 = arith.truncf %9 : vector<128x128xf32> to vector<128x128xbf16>
    %c1 = arith.constant 1 : index
    %c0_3 = arith.constant 0 : index
    %c0_4 = arith.constant 0 : index
    %11 = vector.load %arg3[%c1, %c0_3, %c0_4] : memref<9x128x128xbf16, #tpu.memory_space<vmem>>, vector<1x128x128xbf16>
    %12 = vector.shape_cast %11 : vector<1x128x128xbf16> to vector<128x128xbf16>
    %cst_5 = arith.constant dense<0.000000e+00> : vector<128x128xf32>
    %13 = tpu.matmul %10, %12, %cst_5 {dimension_numbers = #tpu.dot_dimension_numbers<[1], [0], [0], [1], [0, 0, 1, 1], [], []>} : vector<128x128xbf16>, vector<128x128xbf16>, vector<128x128xf32> -> vector<128x128xf32>
    %14 = arith.addf %8, %13 : vector<128x128xf32>
    %15 = vector.extract_strided_slice %3 {offsets = [8, 0], sizes = [128, 128], strides = [1, 1]} : vector<160x128xf32> to vector<128x128xf32>
    %16 = arith.truncf %15 : vector<128x128xf32> to vector<128x128xbf16>
    %c2 = arith.constant 2 : index
    %c0_6 = arith.constant 0 : index
    %c0_7 = arith.constant 0 : index
    %17 = vector.load %arg3[%c2, %c0_6, %c0_7] : memref<9x128x128xbf16, #tpu.memory_space<vmem>>, vector<1x128x128xbf16>
    %18 = vector.shape_cast %17 : vector<1x128x128xbf16> to vector<128x128xbf16>
    %cst_8 = arith.constant dense<0.000000e+00> : vector<128x128xf32>
    %19 = tpu.matmul %16, %18, %cst_8 {dimension_numbers = #tpu.dot_dimension_numbers<[1], [0], [0], [1], [0, 0, 1, 1], [], []>} : vector<128x128xbf16>, vector<128x128xbf16>, vector<128x128xf32> -> vector<128x128xf32>
    %20 = arith.addf %14, %19 : vector<128x128xf32>
    %21 = vector.extract_strided_slice %3 {offsets = [15, 0], sizes = [128, 128], strides = [1, 1]} : vector<160x128xf32> to vector<128x128xf32>
    %22 = arith.truncf %21 : vector<128x128xf32> to vector<128x128xbf16>
    %c3 = arith.constant 3 : index
    %c0_9 = arith.constant 0 : index
    %c0_10 = arith.constant 0 : index
    %23 = vector.load %arg3[%c3, %c0_9, %c0_10] : memref<9x128x128xbf16, #tpu.memory_space<vmem>>, vector<1x128x128xbf16>
    %24 = vector.shape_cast %23 : vector<1x128x128xbf16> to vector<128x128xbf16>
    %cst_11 = arith.constant dense<0.000000e+00> : vector<128x128xf32>
    %25 = tpu.matmul %22, %24, %cst_11 {dimension_numbers = #tpu.dot_dimension_numbers<[1], [0], [0], [1], [0, 0, 1, 1], [], []>} : vector<128x128xbf16>, vector<128x128xbf16>, vector<128x128xf32> -> vector<128x128xf32>
    %26 = arith.addf %20, %25 : vector<128x128xf32>
    %27 = vector.extract_strided_slice %3 {offsets = [16, 0], sizes = [128, 128], strides = [1, 1]} : vector<160x128xf32> to vector<128x128xf32>
    %28 = arith.truncf %27 : vector<128x128xf32> to vector<128x128xbf16>
    %c4 = arith.constant 4 : index
    %c0_12 = arith.constant 0 : index
    %c0_13 = arith.constant 0 : index
    %29 = vector.load %arg3[%c4, %c0_12, %c0_13] : memref<9x128x128xbf16, #tpu.memory_space<vmem>>, vector<1x128x128xbf16>
    %30 = vector.shape_cast %29 : vector<1x128x128xbf16> to vector<128x128xbf16>
    %cst_14 = arith.constant dense<0.000000e+00> : vector<128x128xf32>
    %31 = tpu.matmul %28, %30, %cst_14 {dimension_numbers = #tpu.dot_dimension_numbers<[1], [0], [0], [1], [0, 0, 1, 1], [], []>} : vector<128x128xbf16>, vector<128x128xbf16>, vector<128x128xf32> -> vector<128x128xf32>
    %32 = arith.addf %26, %31 : vector<128x128xf32>
    %33 = vector.extract_strided_slice %3 {offsets = [17, 0], sizes = [128, 128], strides = [1, 1]} : vector<160x128xf32> to vector<128x128xf32>
    %34 = arith.truncf %33 : vector<128x128xf32> to vector<128x128xbf16>
    %c5 = arith.constant 5 : index
    %c0_15 = arith.constant 0 : index
    %c0_16 = arith.constant 0 : index
    %35 = vector.load %arg3[%c5, %c0_15, %c0_16] : memref<9x128x128xbf16, #tpu.memory_space<vmem>>, vector<1x128x128xbf16>
    %36 = vector.shape_cast %35 : vector<1x128x128xbf16> to vector<128x128xbf16>
    %cst_17 = arith.constant dense<0.000000e+00> : vector<128x128xf32>
    %37 = tpu.matmul %34, %36, %cst_17 {dimension_numbers = #tpu.dot_dimension_numbers<[1], [0], [0], [1], [0, 0, 1, 1], [], []>} : vector<128x128xbf16>, vector<128x128xbf16>, vector<128x128xf32> -> vector<128x128xf32>
    %38 = arith.addf %32, %37 : vector<128x128xf32>
    %39 = vector.extract_strided_slice %3 {offsets = [24, 0], sizes = [128, 128], strides = [1, 1]} : vector<160x128xf32> to vector<128x128xf32>
    %40 = arith.truncf %39 : vector<128x128xf32> to vector<128x128xbf16>
    %c6 = arith.constant 6 : index
    %c0_18 = arith.constant 0 : index
    %c0_19 = arith.constant 0 : index
    %41 = vector.load %arg3[%c6, %c0_18, %c0_19] : memref<9x128x128xbf16, #tpu.memory_space<vmem>>, vector<1x128x128xbf16>
    %42 = vector.shape_cast %41 : vector<1x128x128xbf16> to vector<128x128xbf16>
    %cst_20 = arith.constant dense<0.000000e+00> : vector<128x128xf32>
    %43 = tpu.matmul %40, %42, %cst_20 {dimension_numbers = #tpu.dot_dimension_numbers<[1], [0], [0], [1], [0, 0, 1, 1], [], []>} : vector<128x128xbf16>, vector<128x128xbf16>, vector<128x128xf32> -> vector<128x128xf32>
    %44 = arith.addf %38, %43 : vector<128x128xf32>
    %45 = vector.extract_strided_slice %3 {offsets = [25, 0], sizes = [128, 128], strides = [1, 1]} : vector<160x128xf32> to vector<128x128xf32>
    %46 = arith.truncf %45 : vector<128x128xf32> to vector<128x128xbf16>
    %c7 = arith.constant 7 : index
    %c0_21 = arith.constant 0 : index
    %c0_22 = arith.constant 0 : index
    %47 = vector.load %arg3[%c7, %c0_21, %c0_22] : memref<9x128x128xbf16, #tpu.memory_space<vmem>>, vector<1x128x128xbf16>
    %48 = vector.shape_cast %47 : vector<1x128x128xbf16> to vector<128x128xbf16>
    %cst_23 = arith.constant dense<0.000000e+00> : vector<128x128xf32>
    %49 = tpu.matmul %46, %48, %cst_23 {dimension_numbers = #tpu.dot_dimension_numbers<[1], [0], [0], [1], [0, 0, 1, 1], [], []>} : vector<128x128xbf16>, vector<128x128xbf16>, vector<128x128xf32> -> vector<128x128xf32>
    %50 = arith.addf %44, %49 : vector<128x128xf32>
    %51 = vector.extract_strided_slice %3 {offsets = [26, 0], sizes = [128, 128], strides = [1, 1]} : vector<160x128xf32> to vector<128x128xf32>
    %52 = arith.truncf %51 : vector<128x128xf32> to vector<128x128xbf16>
    %c8 = arith.constant 8 : index
    %c0_24 = arith.constant 0 : index
    %c0_25 = arith.constant 0 : index
    %53 = vector.load %arg3[%c8, %c0_24, %c0_25] : memref<9x128x128xbf16, #tpu.memory_space<vmem>>, vector<1x128x128xbf16>
    %54 = vector.shape_cast %53 : vector<1x128x128xbf16> to vector<128x128xbf16>
    %cst_26 = arith.constant dense<0.000000e+00> : vector<128x128xf32>
    %55 = tpu.matmul %52, %54, %cst_26 {dimension_numbers = #tpu.dot_dimension_numbers<[1], [0], [0], [1], [0, 0, 1, 1], [], []>} : vector<128x128xbf16>, vector<128x128xbf16>, vector<128x128xf32> -> vector<128x128xf32>
    %56 = arith.addf %50, %55 : vector<128x128xf32>
    %c0_27 = arith.constant 0 : index
    %c0_28 = arith.constant 0 : index
    %57 = vector.load %arg4[%c0_27, %c0_28] : memref<1x128xf32, #tpu.memory_space<vmem>>, vector<1x128xf32>
    %58 = vector.broadcast %57 : vector<1x128xf32> to vector<128x128xf32>
    %59 = arith.addf %56, %58 : vector<128x128xf32>
    %cst_29 = arith.constant 0.000000e+00 : f32
    %60 = vector.broadcast %cst_29 : f32 to vector<128x128xf32>
    %61 = arith.maximumf %59, %60 : vector<128x128xf32>
    %c0_30 = arith.constant 0 : index
    %c0_31 = arith.constant 0 : index
    %62 = vector.load %arg5[%c0_30, %c0_31] : memref<128x128xf32, #tpu.memory_space<vmem>>, vector<128x128xf32>
    tpu.vector_store %arg5[%c0_30, %c0_31], %61 {strides = array<i32>} : memref<128x128xf32, #tpu.memory_space<vmem>>, vector<128x128xf32>,
    return
  }
  func.func @transform_0(%arg0: i32, %arg1: i32) -> (i32, i32) {
    %c0_i32 = arith.constant 0 : i32
    %c0_i32_0 = arith.constant 0 : i32
    %c0_i32_1 = arith.constant 0 : i32
    return %c0_i32, %c0_i32_0 : i32, i32
  }
  func.func @transform_1(%arg0: i32, %arg1: i32) -> (i32, i32, i32) {
    %c0_i32 = arith.constant 0 : i32
    %c0_i32_0 = arith.constant 0 : i32
    %c0_i32_1 = arith.constant 0 : i32
    return %c0_i32, %c0_i32_0, %arg0 : i32, i32, i32
  }
  func.func @transform_2(%arg0: i32, %arg1: i32) -> (i32, i32) {
    %c0_i32 = arith.constant 0 : i32
    %c0_i32_0 = arith.constant 0 : i32
    return %c0_i32, %arg0 : i32, i32
  }
  func.func @transform_3(%arg0: i32, %arg1: i32) -> (i32, i32) {
    %c0_i32 = arith.constant 0 : i32
    return %arg1, %arg0 : i32, i32
  }
}

</mosaic_0001>

<bundles_post_ra>
// kernel: tpu_custom_call.1
= control target key start
LH: loop header
LB: loop body
LE: loop exit
PB: predicated region body
PF: predicated region fallthrough
CT: control target
= control target key end

     0   :  { %8 = vsyncpa [#allocation3], 0  ;;  %s2561_s0 = inlined_call_operand.hbm [shape: f32[160,128], index: 0, kind: input, shape index: {}]   ;;  %s2562_s1 = inlined_call_operand.hbm [shape: bf16[9,128,128], index: 1, kind: input, shape index: {}]   ;;  %s2563_s2 = inlined_call_operand.vmem [shape: f32[1,128], index: 2, kind: input, shape index: {}]   ;;  %s2564_s3 = inlined_call_operand.hbm [shape: f32[128,128], index: 3, kind: output, shape index: {}]  }
   0x1   :  { %9 = vsyncpa [#allocation6], 0 }
   0x2   :  { %10 = vsyncpa [#allocation4], 0  ;;  %s15_s14 = sshll.u32 %s2561_s0, 4  ;;  %s2100_s15 = smov [#allocation2]   ;;  %s16_s14 = int_to_ptr.hbm [resolvable:$true] %s15_s14 }
   0x3   :  { %s17_s16 = sshll.u32 %s2100_s15, 4  ;;  %s28_s19 = sshll.u32 %s2562_s1, 4  ;;  %s18_s16 = int_to_ptr.vmem [resolvable:$true] %s17_s16  ;;  %s29_s19 = int_to_ptr.hbm [resolvable:$true] %s28_s19 }
   0x4   :  { %s2101_s20 = smov 128   ;;  %s2102_s21 = smov 8  }
   0x5   :  { %23 = dma.hbm_to_vmem [thread:$0]  %s16_s14, 2560, %s18_s16, [#allocation3], %s2101_s20, %s2101_s20, %s2102_s21  }
   0x6   :  { %s2103_s22 = smov [#allocation5]   ;;  %s2104_s24 = smov 64  }
   0x7   :  { %s30_s23 = sshll.u32 %s2103_s22, 4  ;;  %s2105_s0 = smov 4   ;;  %s31_s23 = int_to_ptr.vmem [resolvable:$true] %s30_s23 }
   0x8   :  { %36 = dma.hbm_to_vmem [thread:$0]  %s29_s19, 9216, %s31_s23, [#allocation6], %s2104_s24, %s2104_s24, %s2105_s0  }
   0x9   :  { %2094 = dma.done.wait [#allocation3], 2560  }
   0xa   :  { %2095 = vsyncadd [#allocation3], 4294964736 }
   0xb   :  { %2096 = dma.done.wait [#allocation6], 9216  }
   0xc   :  { %2097 = vsyncadd [#allocation6], 4294958080  ;;  %v1933_v0 = vld [vmem:[#allocation5 + $0x78] sm:$0xff]  ;;  %v1932_v1 = vld [vmem:[#allocation5 + $0x70] sm:$0xff]  ;;  %vm111_vm0 = vsmask.f32 4352 }
   0xd   :  { %1990 = vmatpush.bf16.msra.mxu1 %v1933_v0  ;;  %1991 = vmatpush.bf16.msra.mxu2 %v1933_v0  ;;  %v56_v2 = vld [vmem:[#allocation2 + $0x38] sm:$0xff]  ;;  %v57_v3 = vld [vmem:[#allocation2 + $0x40] sm:$0xff]  ;;  %v58_v4 = vld [vmem:[#allocation2 + $0x48] sm:$0xff]  ;;  %vm306_vm1 = vcmask 1044480   ;;  %vm935_vm2 = vsmask.f32 7424 }
   0xe   :  { %1992 = vmatpush.bf16.msra.mxu3 %v1933_v0  ;;  %248 = vmatpush.bf16.msra.mxu0 %v1933_v0  ;;  %v59_v5 = vld [vmem:[#allocation2 + $0x50] sm:$0xff]  ;;  %v2136_v6 = vpack.c.bf16 %v57_v3, %v56_v2  ;;  %v1931_v8 = vld [vmem:[#allocation5 + $0x68] sm:$0xff]  ;;  %v1930_v9 = vld [vmem:[#allocation5 + $0x60] sm:$0xff]  ;;  %v2161_v24 = vpack.c.bf16 %v58_v4, %v57_v3  ;;  %vm1419_vm3 = vcmask 1046528   ;;  %s1616_s29 = sshll.u32 %s2564_s3, 4  ;;  %s1617_s29 = int_to_ptr.hbm [resolvable:$true] %s1616_s29 }
   0xf   :  { %v2138_v7 = vpack.c.bf16 %v59_v5, %v58_v4  ;;  %v2140_v10 = vld [vmem:[#allocation2 + $0x20] sm:$0xff]  ;;  %v2142_v11 = vld [vmem:[#allocation2 + $0x28] sm:$0xff]  ;;  %v2144_v12 = vld [vmem:[#allocation2 + $0x30] sm:$0xff] }
  0x10   :  { %v60_v13 = vld [vmem:[#allocation2 + $0x58] sm:$0xff]  ;;  %v61_v14 = vld [vmem:[#allocation2 + $0x60] sm:$0xff]  ;;  %v62_v15 = vld [vmem:[#allocation2 + $0x68] sm:$0xff]  ;;  %v2150_v19 = vpack.c.bf16 %v2142_v11, %v2140_v10  ;;  %v2153_v20 = vpack.c.bf16 %v56_v2, %v2144_v12  ;;  %v148_v37 = vshrl.u32 %v2161_v24, 16  ;;  %v151_v38 = vshll.u32 %v2161_v24, 16 }
  0x11   :  { %1993 = vmatpush.bf16.msra.mxu1 %v1932_v1  ;;  %1994 = vmatpush.bf16.msra.mxu2 %v1932_v1  ;;  %v63_v16 = vld [vmem:[#allocation2 + $0x70] sm:$0xff]  ;;  %v2146_v17 = vld [vmem:[#allocation2 + $0x78] sm:$0xff]  ;;  %v49_v18 = vld [vmem:[#allocation2] sm:$0xff]  ;;  %v2163_v25 = vpack.c.bf16 %v60_v13, %v59_v5  ;;  %v2165_v26 = vpack.c.bf16 %v61_v14, %v60_v13  ;;  %v2169_v29 = vpack.c.bf16 %v62_v15, %v61_v14 }
  0x12   :  { %1995 = vmatpush.bf16.msra.mxu3 %v1932_v1  ;;  %249 = vmatpush.bf16.msra.mxu0 %v1932_v1  ;;  %v2155_v21 = vld [vmem:[#allocation2 + $0x8] sm:$0xff]  ;;  %v2157_v22 = vld [vmem:[#allocation2 + $0x10] sm:$0xff]  ;;  %v2159_v23 = vld [vmem:[#allocation2 + $0x18] sm:$0xff]  ;;  %v2167_v27 = vpack.c.bf16 %v63_v16, %v62_v15  ;;  %v2172_v30 = vpack.c.bf16 %v2146_v17, %v63_v16  ;;  %v130_v33 = vshrl.u32 %v2150_v19, 16  ;;  %v133_v34 = vshll.u32 %v2150_v19, 16 }
  0x13   :  { %v1929_v28 = vld [vmem:[#allocation5 + $0x58] sm:$0xff]  ;;  %v2175_v31 = vpack.c.bf16 %v2155_v21, %v49_v18  ;;  %v2179_v32 = vpack.c.bf16 %v2159_v23, %v2157_v22  ;;  %v139_v35 = vshrl.u32 %v2153_v20, 16  ;;  %v142_v36 = vshll.u32 %v2153_v20, 16  ;;  %v1928_v41 = vld [vmem:[#allocation5 + $0x50] sm:$0xff]  ;;  %v1927_v58 = vld [vmem:[#allocation5 + $0x48] sm:$0xff] }
  0x14   :  { %v157_v39 = vshrl.u32 %v2163_v25, 16  ;;  %v160_v40 = vshll.u32 %v2163_v25, 16  ;;  %v2570_v42 = vshrl.u32 %v2169_v29, 16  ;;  %v2573_v43 = vshll.u32 %v2169_v29, 16  ;;  %v1926_v5 = vld [vmem:[#allocation5 + $0x40] sm:$0xff]  ;;  %v1941_v18 = vld [vmem:[#allocation5 + $0xb8] sm:$0xff] }
  0x15   :  { %1996 = vmatpush.bf16.msra.mxu1 %v1931_v8  ;;  %1997 = vmatpush.bf16.msra.mxu2 %v1931_v8  ;;  %v2566_v44 = vshrl.u32 %v2172_v30, 16  ;;  %v2569_v45 = vshll.u32 %v2172_v30, 16  ;;  %v113_v46 = vshrl.u32 %v2175_v31, 16  ;;  %v116_v47 = vshll.u32 %v2175_v31, 16 }
  0x16   :  { %1998 = vmatpush.bf16.msra.mxu3 %v1931_v8  ;;  %250 = vmatpush.bf16.msra.mxu0 %v1931_v8  ;;  %v121_v48 = vshrl.u32 %v2179_v32, 16  ;;  %v124_v49 = vshll.u32 %v2179_v32, 16  ;;  %v132_v50 = vrot.slane %v130_v33, 3  ;;  %v135_v51 = vrot.slane %v133_v34, 4 }
  0x17   :  { %v141_v52 = vrot.slane %v139_v35, 3  ;;  %v144_v53 = vrot.slane %v142_v36, 4  ;;  %v150_v54 = vrot.slane %v148_v37, 3  ;;  %v153_v55 = vrot.slane %v151_v38, 4 }
  0x18   :  { %v159_v56 = vrot.slane %v157_v39, 3  ;;  %v162_v57 = vrot.slane %v160_v40, 4  ;;  %v168_v59 = vrot.slane %v2570_v42, 3  ;;  %v171_v60 = vrot.slane %v2573_v43, 4 }
  0x19   :  { %1999 = vmatpush.bf16.msra.mxu1 %v1930_v9  ;;  %2000 = vmatpush.bf16.msra.mxu2 %v1930_v9  ;;  %v177_v61 = vrot.slane %v2566_v44, 3  ;;  %v180_v62 = vrot.slane %v2569_v45, 4  ;;  %v115_v63 = vrot.slane %v113_v46, 3  ;;  %v118_v0 = vrot.slane %v116_v47, 4 }
  0x1a   :  { %2001 = vmatpush.bf16.msra.mxu3 %v1930_v9  ;;  %251 = vmatpush.bf16.msra.mxu0 %v1930_v9  ;;  %v123_v1 = vrot.slane %v121_v48, 3  ;;  %v126_v2 = vrot.slane %v124_v49, 4  ;;  %v2225_v3 = vor.u32 %v135_v51, %v132_v50  ;;  %v2227_v4 = vor.u32 %v144_v53, %v141_v52  ;;  %v1949_v51 = vld [vmem:[#allocation5 + $0xf8] sm:$0xff] }
  0x1b   :  { %v154_v8 = vor.u32 %v153_v55, %v150_v54  ;;  %v163_v9 = vor.u32 %v162_v57, %v159_v56  ;;  %v172_v13 = vor.u32 %v171_v60, %v168_v59  ;;  %v181_v14 = vor.u32 %v180_v62, %v177_v61  ;;  %v1957_v53 = vld [vmem:[#allocation5 + $0x138] sm:$0xff]  ;;  %v1940_v55 = vld [vmem:[#allocation5 + $0xb0] sm:$0xff]  ;;  %v1939_v61 = vld [vmem:[#allocation5 + $0xa8] sm:$0xff] }
  0x1c   :  { %v119_v15 = vor.u32 %v118_v0, %v115_v63  ;;  %v127_v16 = vor.u32 %v126_v2, %v123_v1  ;;  %v146_v46 = vsel %vm111_vm0, %v2225_v3, %v2227_v4  ;;  %v1924_v56 = vld [vmem:[#allocation5 + $0x30] sm:$0xff]  ;;  %v1923_v62 = vld [vmem:[#allocation5 + $0x28] sm:$0xff] }
  0x1d   :  { %2002 = vmatpush.bf16.msra.mxu1 %v1929_v28  ;;  %2003 = vmatpush.bf16.msra.mxu2 %v1929_v28  ;;  %v164_v47 = vsel %vm111_vm0, %v154_v8, %v163_v9  ;;  %v182_v50 = vsel %vm111_vm0, %v172_v13, %v181_v14  ;;  %v1948_v57 = vld [vmem:[#allocation5 + $0xf0] sm:$0xff]  ;;  %v1947_v63 = vld [vmem:[#allocation5 + $0xe8] sm:$0xff] }
  0x1e   :  { %2004 = vmatpush.bf16.msra.mxu3 %v1929_v28  ;;  %252 = vmatpush.bf16.msra.mxu0 %v1929_v28  ;;  %v1925_v28 = vld [vmem:[#allocation5 + $0x38] sm:$0xff]  ;;  %v128_v52 = vsel %vm111_vm0, %v119_v15, %v127_v16  ;;  %v1955_v0 = vld [vmem:[#allocation5 + $0x128] sm:$0xff]  ;;  %v1922_v15 = vld [vmem:[#allocation5 + $0x20] sm:$0xff] }
  0x21   :  { %2005 = vmatpush.bf16.msra.mxu1 %v1928_v41  ;;  %2006 = vmatpush.bf16.msra.mxu2 %v1928_v41 }
  0x22   :  { %2007 = vmatpush.bf16.msra.mxu3 %v1928_v41  ;;  %253 = vmatpush.bf16.msra.mxu0 %v1928_v41  ;;  %v2229_v41 = vld [vmem:[#allocation2 + $0x80] sm:$0xff] }
  0x23   :  { %v2239_v54 = vpack.c.bf16 %v2229_v41, %v2229_v41 }
  0x25   :  { %2008 = vmatpush.bf16.msra.mxu1 %v1927_v58  ;;  %2009 = vmatpush.bf16.msra.mxu2 %v1927_v58  ;;  %v184_v59 = vshrl.u32 %v2239_v54, 16  ;;  %v187_v60 = vshll.u32 %v2239_v54, 16 }
  0x26   :  { %2010 = vmatpush.bf16.msra.mxu3 %v1927_v58  ;;  %254 = vmatpush.bf16.msra.mxu0 %v1927_v58  ;;  %v1956_v58 = vld [vmem:[#allocation5 + $0x130] sm:$0xff] }
  0x27   :  { %v186_v1 = vrot.slane %v184_v59, 3  ;;  %v189_v2 = vrot.slane %v187_v60, 4  ;;  %v429_v59 = vpack.c.bf16 %v2157_v22, %v2155_v21  ;;  %v1935_v21 = vld [vmem:[#allocation5 + $0x88] sm:$0xff] }
  0x28   :  { %v1919_v22 = vld [vmem:[#allocation5 + $0x8] sm:$0xff] }
  0x29   :  { %2011 = vmatpush.bf16.msra.mxu1 %v1926_v5  ;;  %2012 = vmatpush.bf16.msra.mxu2 %v1926_v5  ;;  %v1951_v60 = vld [vmem:[#allocation5 + $0x108] sm:$0xff] }
  0x2a   :  { %2013 = vmatpush.bf16.msra.mxu3 %v1926_v5  ;;  %255 = vmatpush.bf16.msra.mxu0 %v1926_v5  ;;  %v1938_v5 = vld [vmem:[#allocation5 + $0xa0] sm:$0xff] }
  0x2c   :  { %266 = vmatmul.bf16.vlgmr.msra.gmra.mxu1 %v146_v46  ;;  %276 = vmatmul.bf16.vlgmr.msra.gmra.mxu2 %v164_v47  ;;  %v190_v46 = vor.u32 %v189_v2, %v186_v1  ;;  %v1937_v47 = vld [vmem:[#allocation5 + $0x98] sm:$0xff]  ;;  %v1934_v1 = vld [vmem:[#allocation5 + $0x80] sm:$0xff] }
  0x2d   :  { %502 = vmatpush.bf16.msrb.mxu2 %v1941_v18  ;;  %380 = vmatpush.bf16.msrb.mxu1 %v1925_v28  ;;  %v1946_v18 = vld [vmem:[#allocation5 + $0xe0] sm:$0xff] }
  0x2e   :  { %286 = vmatmul.bf16.vlgmr.msra.gmra.mxu3 %v182_v50  ;;  %256 = vmatmul.bf16.vlgmr.msra.gmra.mxu0 %v128_v52  ;;  %v1954_v28 = vld [vmem:[#allocation5 + $0x120] sm:$0xff]  ;;  %v1921_v50 = vld [vmem:[#allocation5 + $0x18] sm:$0xff]  ;;  %v155_v52 = vsel %vm111_vm0, %v2227_v4, %v154_v8  ;;  %v1944_v4 = vld [vmem:[#allocation5 + $0xd0] sm:$0xff] }
  0x2f   :  { %721 = vmatpush.bf16.msrb.mxu3 %v1949_v51  ;;  %852 = vmatpush.bf16.msrb.mxu0 %v1957_v53  ;;  %v2245_v51 = vpack.c.bf16 %v2140_v10, %v2159_v23  ;;  %v173_v53 = vsel %vm111_vm0, %v163_v9, %v172_v13  ;;  %v1936_v10 = vld [vmem:[#allocation5 + $0x90] sm:$0xff]  ;;  %v586_v9 = vshrl.u32 %v429_v59, 16  ;;  %v589_v13 = vshll.u32 %v429_v59, 16  ;;  %v1918_v2 = vld [vmem:[#allocation5] sm:$0xff] }
  0x30   :  { %v1920_v23 = vld [vmem:[#allocation5 + $0x10] sm:$0xff] }
  0x31   :  { %503 = vmatpush.bf16.msrb.mxu2 %v1940_v55  ;;  %381 = vmatpush.bf16.msrb.mxu1 %v1924_v56  ;;  %v191_v55 = vsel %vm111_vm0, %v181_v14, %v190_v46  ;;  %v1945_v56 = vld [vmem:[#allocation5 + $0xd8] sm:$0xff]  ;;  %v1952_v8 = vld [vmem:[#allocation5 + $0x110] sm:$0xff]  ;;  %v597_v14 = vshll.u32 %v2245_v51, 16  ;;  %v1942_v46 = vld [vmem:[#allocation5 + $0xc0] sm:$0xff] }
  0x33   :  { %722 = vmatpush.bf16.msrb.mxu3 %v1948_v57  ;;  %853 = vmatpush.bf16.msrb.mxu0 %v1956_v58  ;;  %v137_v57 = vsel %vm111_vm0, %v127_v16, %v2225_v3  ;;  %v1953_v58 = vld [vmem:[#allocation5 + $0x118] sm:$0xff]  ;;  %v594_v3 = vshrl.u32 %v2245_v51, 16  ;;  %v1943_v16 = vld [vmem:[#allocation5 + $0xc8] sm:$0xff] }
  0x35   :  { %504 = vmatpush.bf16.msrb.mxu2 %v1939_v61  ;;  %382 = vmatpush.bf16.msrb.mxu1 %v1923_v62  ;;  %v588_v61 = vrot.slane %v586_v9, 3  ;;  %v591_v62 = vrot.slane %v589_v13, 4  ;;  %v1963_v9 = vld [vmem:[#allocation5 + $0x168] sm:$0xff] }
  0x36   :  { %v1979_v13 = vld [vmem:[#allocation5 + $0x1e8] sm:$0xff] }
  0x37   :  { %723 = vmatpush.bf16.msrb.mxu3 %v1947_v63  ;;  %854 = vmatpush.bf16.msrb.mxu0 %v1955_v0  ;;  %v596_v63 = vrot.slane %v594_v3, 3  ;;  %v599_v0 = vrot.slane %v597_v14, 4 }
  0x39   :  { %505 = vmatpush.bf16.msrb.mxu2 %v1938_v5  ;;  %383 = vmatpush.bf16.msrb.mxu1 %v1922_v15  ;;  %v1973_v5 = vld [vmem:[#allocation5 + $0x1b8] sm:$0xff] }
  0x3a   :  { %v1965_v15 = vld [vmem:[#allocation5 + $0x178] sm:$0xff] }
  0x3b   :  { %724 = vmatpush.bf16.msrb.mxu3 %v1946_v18  ;;  %855 = vmatpush.bf16.msrb.mxu0 %v1954_v28  ;;  %v307_v18 = vrot.slane %v2175_v31, 3  ;;  %v308_v28 = vrot.slane %v2179_v32, 3  ;;  %v2266_v31 = vpack.c.bf16 %v2144_v12, %v2142_v11  ;;  %v1971_v12 = vld [vmem:[#allocation5 + $0x1a8] sm:$0xff] }
  0x3c   :  { %271 = vmatmul.bf16.gmra.mxu1 %v155_v52  ;;  %281 = vmatmul.bf16.gmra.mxu2 %v173_v53  ;;  %v600_v52 = vor.u32 %v599_v0, %v596_v63  ;;  %v1981_v53 = vld [vmem:[#allocation5 + $0x1f8] sm:$0xff]  ;;  %v1970_v63 = vld [vmem:[#allocation5 + $0x1a0] sm:$0xff] }
  0x3d   :  { %506 = vmatpush.bf16.msrb.mxu2 %v1937_v47  ;;  %384 = vmatpush.bf16.msrb.mxu1 %v1921_v50  ;;  %v1950_v47 = vld [vmem:[#allocation5 + $0x100] sm:$0xff]  ;;  %v592_v50 = vor.u32 %v591_v62, %v588_v61  ;;  %v606_v11 = vshll.u32 %v2266_v31, 16 }
  0x3e   :  { %291 = vmatmul.bf16.gmra.mxu3 %v191_v55  ;;  %261 = vmatmul.bf16.gmra.mxu0 %v137_v57  ;;  %v1989_v55 = vld [vmem:[#allocation5 + $0x238] sm:$0xff]  ;;  %v1978_v0 = vld [vmem:[#allocation5 + $0x1e0] sm:$0xff] }
  0x3f   :  { %725 = vmatpush.bf16.msrb.mxu3 %v1945_v56  ;;  %856 = vmatpush.bf16.msrb.mxu0 %v1953_v58  ;;  %v309_v56 = vsel %vm306_vm1, %v307_v18, %v308_v28  ;;  %v601_v57 = vsel %vm111_vm0, %v592_v50, %v600_v52  ;;  %v1972_v58 = vld [vmem:[#allocation5 + $0x1b0] sm:$0xff] }
  0x41   :  { %507 = vmatpush.bf16.msrb.mxu2 %v1936_v10  ;;  %385 = vmatpush.bf16.msrb.mxu1 %v1920_v23  ;;  %v1964_v10 = vld [vmem:[#allocation5 + $0x170] sm:$0xff] }
  0x42   :  { %v1980_v23 = vld [vmem:[#allocation5 + $0x1f0] sm:$0xff] }
  0x43   :  { %726 = vmatpush.bf16.msrb.mxu3 %v1944_v4  ;;  %857 = vmatpush.bf16.msrb.mxu0 %v1952_v8  ;;  %v1988_v4 = vld [vmem:[#allocation5 + $0x230] sm:$0xff]  ;;  %v603_v8 = vshrl.u32 %v2266_v31, 16 }
  0x45   :  { %508 = vmatpush.bf16.msrb.mxu2 %v1935_v21  ;;  %386 = vmatpush.bf16.msrb.mxu1 %v1919_v22  ;;  %v1987_v21 = vld [vmem:[#allocation5 + $0x228] sm:$0xff]  ;;  %v605_v22 = vrot.slane %v603_v8, 3 }
  0x47   :  { %727 = vmatpush.bf16.msrb.mxu3 %v1943_v16  ;;  %858 = vmatpush.bf16.msrb.mxu0 %v1951_v60  ;;  %v310_v16 = vrot.slane %v2150_v19, 3 }
  0x49   :  { %509 = vmatpush.bf16.msrb.mxu2 %v1934_v1  ;;  %387 = vmatpush.bf16.msrb.mxu1 %v1918_v2  ;;  %v311_v61 = vsel %vm306_vm1, %v308_v28, %v310_v16  ;;  %v1962_v1 = vld [vmem:[#allocation5 + $0x160] sm:$0xff]  ;;  %v612_v2 = vshrl.u32 %v2136_v6, 16 }
  0x4b   :  { %728 = vmatpush.bf16.msrb.mxu3 %v1942_v46  ;;  %859 = vmatpush.bf16.msrb.mxu0 %v1950_v47  ;;  %v614_v18 = vrot.slane %v612_v2, 3  ;;  %v312_v46 = vrot.slane %v2153_v20, 3 }
  0x4c   :  { %388 = vmatmul.bf16.vlgmr.msrb.gmra.mxu1 %v309_v56  ;;  %510 = vmatmul.bf16.vlgmr.msrb.gmra.mxu2 %v429_v59  ;;  %v608_v59 = vrot.slane %v606_v11, 4  ;;  %v1961_v56 = vld [vmem:[#allocation5 + $0x158] sm:$0xff] }
  0x4d   :  { %1156 = vmatpush.bf16.msra.mxu2 %v1973_v5  ;;  %1025 = vmatpush.bf16.msra.mxu1 %v1965_v15  ;;  %v615_v5 = vshll.u32 %v2136_v6, 16  ;;  %v1986_v15 = vld [vmem:[#allocation5 + $0x220] sm:$0xff]  ;;  %v313_v50 = vsel %vm306_vm1, %v310_v16, %v312_v46  ;;  %v1960_v16 = vld [vmem:[#allocation5 + $0x150] sm:$0xff] }
  0x4e   :  { %729 = vmatmul.bf16.vlgmr.msrb.gmra.mxu3 %v601_v57  ;;  %860 = vmatmul.bf16.vlgmr.msrb.gmra.mxu0 %v2179_v32  ;;  %v609_v60 = vor.u32 %v608_v59, %v605_v22  ;;  %v621_v57 = vshrl.u32 %v2138_v7, 16  ;;  %v1968_v22 = vld [vmem:[#allocation5 + $0x190] sm:$0xff] }
  0x4f   :  { %1328 = vmatpush.bf16.msra.mxu3 %v1981_v53  ;;  %1493 = vmatpush.bf16.msra.mxu0 %v1989_v55  ;;  %v617_v28 = vrot.slane %v615_v5, 4  ;;  %v1969_v53 = vld [vmem:[#allocation5 + $0x198] sm:$0xff]  ;;  %v1976_v59 = vld [vmem:[#allocation5 + $0x1d0] sm:$0xff] }
  0x50   :  { %v610_v62 = vsel %vm111_vm0, %v600_v52, %v609_v60  ;;  %v1977_v55 = vld [vmem:[#allocation5 + $0x1d8] sm:$0xff] }
  0x51   :  { %1157 = vmatpush.bf16.msra.mxu2 %v1972_v58  ;;  %1026 = vmatpush.bf16.msra.mxu1 %v1964_v10  ;;  %v618_v47 = vor.u32 %v617_v28, %v614_v18  ;;  %v624_v58 = vshll.u32 %v2138_v7, 16  ;;  %v1985_v10 = vld [vmem:[#allocation5 + $0x218] sm:$0xff] }
  0x53   :  { %1329 = vmatpush.bf16.msra.mxu3 %v1980_v23  ;;  %1494 = vmatpush.bf16.msra.mxu0 %v1988_v4  ;;  %v619_v52 = vsel %vm111_vm0, %v609_v60, %v618_v47  ;;  %v623_v23 = vrot.slane %v621_v57, 3  ;;  %v626_v4 = vrot.slane %v624_v58, 4  ;;  %v2572_v60 = vshrl.u32 %v2165_v26, 16 }
  0x55   :  { %1158 = vmatpush.bf16.msra.mxu2 %v1971_v12  ;;  %1027 = vmatpush.bf16.msra.mxu1 %v1963_v9  ;;  %v314_v12 = vrot.slane %v2161_v24, 3  ;;  %v627_v9 = vor.u32 %v626_v4, %v623_v23  ;;  %v318_v23 = vrot.slane %v2169_v29, 3 }
  0x57   :  { %1330 = vmatpush.bf16.msra.mxu3 %v1979_v13  ;;  %1495 = vmatpush.bf16.msra.mxu0 %v1987_v21  ;;  %v315_v13 = vsel %vm306_vm1, %v312_v46, %v314_v12  ;;  %v628_v21 = vsel %vm111_vm0, %v618_v47, %v627_v9  ;;  %v1967_v46 = vld [vmem:[#allocation5 + $0x188] sm:$0xff] }
  0x58   :  { %v1975_v47 = vld [vmem:[#allocation5 + $0x1c8] sm:$0xff] }
  0x59   :  { %1159 = vmatpush.bf16.msra.mxu2 %v1970_v63  ;;  %1028 = vmatpush.bf16.msra.mxu1 %v1962_v1  ;;  %v632_v63 = vrot.slane %v2572_v60, 3  ;;  %v316_v1 = vrot.slane %v2163_v25, 3 }
  0x5b   :  { %1331 = vmatpush.bf16.msra.mxu3 %v1978_v0  ;;  %1496 = vmatpush.bf16.msra.mxu0 %v1986_v15  ;;  %v317_v18 = vsel %vm306_vm1, %v314_v12, %v316_v1  ;;  %v319_v12 = vsel %vm306_vm1, %v316_v1, %v318_v23  ;;  %v320_v1 = vrot.slane %v2172_v30, 3 }
  0x5c   :  { %393 = vmatmul.bf16.gmra.mxu1 %v311_v61  ;;  %515 = vmatmul.bf16.gmra.mxu2 %v2245_v51  ;;  %v633_v61 = vshll.u32 %v2165_v26, 16 }
  0x5d   :  { %1160 = vmatpush.bf16.msra.mxu2 %v1969_v53  ;;  %1029 = vmatpush.bf16.msra.mxu1 %v1961_v56  ;;  %v1959_v53 = vld [vmem:[#allocation5 + $0x148] sm:$0xff] }
  0x5e   :  { %734 = vmatmul.bf16.gmra.mxu3 %v610_v62  ;;  %865 = vmatmul.bf16.gmra.mxu0 %v2150_v19  ;;  %v1984_v62 = vld [vmem:[#allocation5 + $0x210] sm:$0xff]  ;;  %v635_v0 = vrot.slane %v633_v61, 4 }
  0x5f   :  { %1332 = vmatpush.bf16.msra.mxu3 %v1977_v55  ;;  %1497 = vmatpush.bf16.msra.mxu0 %v1985_v10  ;;  %v1983_v10 = vld [vmem:[#allocation5 + $0x208] sm:$0xff] }
  0x60   :  { %v636_v15 = vor.u32 %v635_v0, %v632_v63  ;;  %v1982_v0 = vld [vmem:[#allocation5 + $0x200] sm:$0xff] }
  0x61   :  { %1161 = vmatpush.bf16.msra.mxu2 %v1968_v22  ;;  %1030 = vmatpush.bf16.msra.mxu1 %v1960_v16  ;;  %v1974_v22 = vld [vmem:[#allocation5 + $0x1c0] sm:$0xff] }
  0x62   :  { %v637_v28 = vsel %vm111_vm0, %v627_v9, %v636_v15  ;;  %v2324_v9 = vpack.c.bf16 %v2229_v41, %v2146_v17 }
  0x63   :  { %1333 = vmatpush.bf16.msra.mxu3 %v1976_v59  ;;  %1498 = vmatpush.bf16.msra.mxu0 %v1984_v62  ;;  %v1958_v62 = vld [vmem:[#allocation5 + $0x140] sm:$0xff] }
  0x64   :  { %v2565_v59 = vshrl.u32 %v2324_v9, 16  ;;  %v2567_v16 = vshll.u32 %v2324_v9, 16 }
  0x65   :  { %1162 = vmatpush.bf16.msra.mxu2 %v1967_v46  ;;  %1031 = vmatpush.bf16.msra.mxu1 %v1959_v53  ;;  %v321_v46 = vsel %vm306_vm1, %v318_v23, %v320_v1 }
  0x66   :  { %v650_v17 = vrot.slane %v2565_v59, 3  ;;  %v653_v63 = vrot.slane %v2567_v16, 4 }
  0x67   :  { %1334 = vmatpush.bf16.msra.mxu3 %v1975_v47  ;;  %1499 = vmatpush.bf16.msra.mxu0 %v1983_v10 }
  0x69   :  { %1032 = vmatpush.bf16.msra.mxu1 %v1958_v62  ;;  %v322_v62 = vrot.slane %v2239_v54, 3 }
  0x6b   :  { %1335 = vmatpush.bf16.msra.mxu3 %v1974_v22  ;;  %1500 = vmatpush.bf16.msra.mxu0 %v1982_v0 }
  0x6c   :  { %398 = vmatmul.bf16.gmra.mxu1 %v313_v50  ;;  %520 = vmatmul.bf16.gmra.mxu2 %v2266_v31  ;;  %v2568_v50 = vshrl.u32 %v2167_v27, 16 }
  0x6e   :  { %739 = vmatmul.bf16.gmra.mxu3 %v619_v52  ;;  %870 = vmatmul.bf16.gmra.mxu0 %v2153_v20  ;;  %v2571_v52 = vshll.u32 %v2167_v27, 16  ;;  %v641_v55 = vrot.slane %v2568_v50, 3 }
  0x70   :  { %v644_v56 = vrot.slane %v2571_v52, 4 }
  0x72   :  { %v645_v4 = vor.u32 %v644_v56, %v641_v55 }
  0x7c   :  { %403 = vmatmul.bf16.gmra.mxu1 %v315_v13  ;;  %525 = vmatmul.bf16.gmra.mxu2 %v2136_v6  ;;  %v646_v13 = vsel %vm111_vm0, %v636_v15, %v645_v4  ;;  %v654_v15 = vor.u32 %v653_v63, %v650_v17 }
  0x7e   :  { %744 = vmatmul.bf16.gmra.mxu3 %v628_v21  ;;  %875 = vmatmul.bf16.gmra.mxu0 %v2161_v24  ;;  %v1966_v21 = vld [vmem:[#allocation5 + $0x180] sm:$0xff]  ;;  %v655_v53 = vsel %vm111_vm0, %v645_v4, %v654_v15 }
  0x7f   :  { %1163 = vmatpush.bf16.msra.mxu2 %v1966_v21 }
  0x8c   :  { %408 = vmatmul.bf16.gmra.mxu1 %v317_v18  ;;  %530 = vmatmul.bf16.gmra.mxu2 %v2138_v7  ;;  %v2336_v18 = vld [vmem:[#allocation2 + $0x88] sm:$0xff] }
  0x8d   :  { %v567_v55 = vpack.c.bf16 %v2336_v18, %v2336_v18 }
  0x8e   :  { %749 = vmatmul.bf16.gmra.mxu3 %v637_v28  ;;  %880 = vmatmul.bf16.gmra.mxu0 %v2163_v25 }
  0x8f   :  { %v657_v56 = vshrl.u32 %v567_v55, 16  ;;  %v660_v10 = vshll.u32 %v567_v55, 16  ;;  %v2362_v55 = vpack.c.bf16 %v2336_v18, %v2229_v41 }
  0x91   :  { %v659_v22 = vrot.slane %v657_v56, 3  ;;  %v662_v4 = vrot.slane %v660_v10, 4 }
  0x93   :  { %v663_v17 = vor.u32 %v662_v4, %v659_v22  ;;  %v1239_v22 = vrot.slane %v597_v14, 1 }
  0x95   :  { %v664_v44 = vsel %vm111_vm0, %v654_v15, %v663_v17  ;;  %v1240_v4 = vor.u32 %v1239_v22, %v594_v3  ;;  %v1420_v17 = vrot.slane %v2245_v51, 1 }
  0x9c   :  { %413 = vmatmul.bf16.gmra.mxu1 %v319_v12  ;;  %535 = vmatmul.bf16.gmra.mxu2 %v2165_v26 }
  0x9e   :  { %754 = vmatmul.bf16.gmra.mxu3 %v646_v13  ;;  %885 = vmatmul.bf16.gmra.mxu0 %v2169_v29 }
  0xa9   :  { %v2338_v28 = vpop.f32.mrf.mxu1 }
  0xab   :  { %v257_v47 = vpop.f32.mrf.mxu0 }
  0xac   :  { %418 = vmatmul.bf16.gmra.mxu1 %v321_v46  ;;  %540 = vmatmul.bf16.gmra.mxu2 %v2167_v27 }
  0xae   :  { %759 = vmatmul.bf16.gmra.mxu3 %v655_v53  ;;  %890 = vmatmul.bf16.gmra.mxu0 %v2172_v30  ;;  %v323_v53 = vsel %vm306_vm1, %v320_v1, %v322_v62  ;;  %v936_v1 = vrot.slane %v124_v49, 1  ;;  %v1241_v62 = vrot.slane %v606_v11, 1  ;;  %v1421_v49 = vrot.slane %v2266_v31, 1 }
  0xaf   :  { %v2346_v12 = vpop.f32.mrf.mxu2 }
  0xb0   :  { %v937_v15 = vor.u32 %v936_v1, %v121_v48  ;;  %v1242_v16 = vsel %vm935_vm2, %v1240_v4, %v1241_v62  ;;  %v1422_v3 = vsel %vm1419_vm3, %v1420_v17, %v1421_v49  ;;  %v1423_v4 = vrot.slane %v2136_v6, 1 }
  0xb1   :  { %v2348_v13 = vpop.f32.mrf.mxu3  ;;  %v2350_v21 = vpop.f32.mrf.mxu1 }
  0xb3   :  { %v259_v23 = vpop.f32.mrf.mxu0 }
  0xb7   :  { %v2353_v63 = vpop.f32.mrf.mxu2 }
  0xb9   :  { %v2355_v0 = vpop.f32.mrf.mxu3  ;;  %v2357_v46 = vpop.f32.mrf.mxu1 }
  0xbb   :  { %v262_v59 = vpop.f32.mrf.mxu0 }
  0xbc   :  { %423 = vmatmul.bf16.gmra.mxu1 %v323_v53  ;;  %545 = vmatmul.bf16.gmra.mxu2 %v2324_v9 }
  0xbe   :  { %764 = vmatmul.bf16.gmra.mxu3 %v664_v44  ;;  %895 = vmatmul.bf16.gmra.mxu0 %v2362_v55  ;;  %v938_v44 = vrot.slane %v133_v34, 1 }
  0xbf   :  { %v2367_v54 = vpop.f32.mrf.mxu2 }
  0xc0   :  { %v939_v48 = vsel %vm935_vm2, %v937_v15, %v938_v44  ;;  %v941_v15 = vrot.slane %v142_v36, 1  ;;  %v1424_v36 = vsel %vm1419_vm3, %v1421_v49, %v1423_v4  ;;  %v944_v49 = vrot.slane %v151_v38, 1 }
  0xc1   :  { %v2369_v56 = vpop.f32.mrf.mxu3  ;;  %v2371_v10 = vpop.f32.mrf.mxu1 }
  0xc3   :  { %v264_v41 = vpop.f32.mrf.mxu0 }
  0xc7   :  { %v2387_v53 = vpop.f32.mrf.mxu2 }
  0xc9   :  { %v2389_v14 = vpop.f32.mrf.mxu3  ;;  %v389_v32 = vpop.f32.mrf.mxu1 }
  0xca   :  { %v390_v1 = vadd.f32 %v389_v32, %v257_v47  ;;  %v940_v47 = vor.u32 %v938_v44, %v130_v33 }
  0xcb   :  { %v861_v34 = vpop.f32.mrf.mxu0 }
  0xcc   :  { %1033 = vmatmul.bf16.vlgmr.msra.gmra.mxu1 %v939_v48  ;;  %1164 = vmatmul.bf16.vlgmr.msra.gmra.mxu2 %v2245_v51  ;;  %v1243_v51 = vor.u32 %v1241_v62, %v603_v8 }
  0xce   :  { %1336 = vmatmul.bf16.vlgmr.msra.gmra.mxu3 %v1242_v16  ;;  %1501 = vmatmul.bf16.vlgmr.msra.gmra.mxu0 %v1422_v3  ;;  %v1244_v16 = vrot.slane %v615_v5, 1 }
  0xcf   :  { %v511_v11 = vpop.f32.mrf.mxu2 }
  0xd0   :  { %v551_v22 = vadd.f32 %v511_v11, %v390_v1  ;;  %v1245_v44 = vsel %vm935_vm2, %v1243_v51, %v1244_v16  ;;  %v943_v11 = vor.u32 %v941_v15, %v139_v35 }
  0xd1   :  { %v730_v50 = vpop.f32.mrf.mxu3  ;;  %v391_v45 = vpop.f32.mrf.mxu1 }
  0xd2   :  { %v770_v42 = vadd.f32 %v730_v50, %v551_v22  ;;  %v392_v52 = vadd.f32 %v391_v45, %v259_v23  ;;  %v1425_v22 = vrot.slane %v2138_v7, 1 }
  0xd3   :  { %v863_v60 = vpop.f32.mrf.mxu0 }
  0xd4   :  { %v2395_v43 = vadd.f32 %v861_v34, %v770_v42  ;;  %v942_v42 = vsel %vm935_vm2, %v940_v47, %v941_v15  ;;  %v1426_v15 = vsel %vm1419_vm3, %v1423_v4, %v1425_v22  ;;  %v946_v4 = vor.u32 %v944_v49, %v148_v37 }
  0xd7   :  { %v513_v17 = vpop.f32.mrf.mxu2 }
  0xd8   :  { %v552_v50 = vadd.f32 %v513_v17, %v392_v52 }
  0xd9   :  { %v732_v45 = vpop.f32.mrf.mxu3  ;;  %v394_v23 = vpop.f32.mrf.mxu1 }
  0xda   :  { %v771_v32 = vadd.f32 %v732_v45, %v552_v50  ;;  %v395_v19 = vadd.f32 %v394_v23, %v262_v59  ;;  %v945_v50 = vsel %vm935_vm2, %v943_v11, %v944_v49 }
  0xdb   :  { %v866_v33 = vpop.f32.mrf.mxu0 }
  0xdc   :  { %1038 = vmatmul.bf16.gmra.mxu1 %v942_v42  ;;  %1169 = vmatmul.bf16.gmra.mxu2 %v2266_v31  ;;  %v2410_v8 = vadd.f32 %v863_v60, %v771_v32  ;;  %v1246_v31 = vor.u32 %v1244_v16, %v612_v2  ;;  %v1247_v60 = vrot.slane %v624_v58, 1 }
  0xde   :  { %1341 = vmatmul.bf16.gmra.mxu3 %v1245_v44  ;;  %1506 = vmatmul.bf16.gmra.mxu0 %v1424_v36  ;;  %v1248_v38 = vsel %vm935_vm2, %v1246_v31, %v1247_v60  ;;  %v1249_v44 = vor.u32 %v1247_v60, %v621_v57  ;;  %v1250_v36 = vrot.slane %v633_v61, 1 }
  0xdf   :  { %v516_v5 = vpop.f32.mrf.mxu2 }
  0xe0   :  { %v553_v52 = vadd.f32 %v516_v5, %v395_v19  ;;  %v1427_v5 = vrot.slane %v2165_v26, 1 }
  0xe1   :  { %v735_v62 = vpop.f32.mrf.mxu3  ;;  %v396_v48 = vpop.f32.mrf.mxu1 }
  0xe2   :  { %v772_v1 = vadd.f32 %v735_v62, %v553_v52  ;;  %v397_v34 = vadd.f32 %v396_v48, %v264_v41 }
  0xe3   :  { %v868_v3 = vpop.f32.mrf.mxu0 }
  0xe4   :  { %v2412_v59 = vadd.f32 %v866_v33, %v772_v1 }
  0xe7   :  { %v518_v47 = vpop.f32.mrf.mxu2 }
  0xe8   :  { %v554_v51 = vadd.f32 %v518_v47, %v397_v34 }
  0xe9   :  { %v737_v41 = vpop.f32.mrf.mxu3  ;;  %v399_v17 = vpop.f32.mrf.mxu1 }
  0xea   :  { %v773_v45 = vadd.f32 %v737_v41, %v554_v51  ;;  %v400_v20 = vadd.f32 %v399_v17, %v2338_v28  ;;  %v2574_v41 = vshll.u32 %v2169_v29, 16  ;;  %v2575_v17 = vshrl.u32 %v2165_v26, 16 }
  0xeb   :  { %v871_v35 = vpop.f32.mrf.mxu0 }
  0xec   :  { %1043 = vmatmul.bf16.gmra.mxu1 %v945_v50  ;;  %1174 = vmatmul.bf16.gmra.mxu2 %v2136_v6  ;;  %v2428_v2 = vadd.f32 %v868_v3, %v773_v45  ;;  %v947_v6 = vrot.slane %v160_v40, 1  ;;  %v1251_v40 = vsel %vm935_vm2, %v1249_v44, %v1250_v36  ;;  %v1428_v3 = vsel %vm1419_vm3, %v1425_v22, %v1427_v5 }
  0xed   :  { %v1252_v50 = vor.u32 %v1250_v36, %v2575_v17  ;;  %v2576_v45 = vshll.u32 %v2167_v27, 16 }
  0xee   :  { %1346 = vmatmul.bf16.gmra.mxu3 %v1248_v38  ;;  %1511 = vmatmul.bf16.gmra.mxu0 %v1426_v15  ;;  %v948_v1 = vsel %vm935_vm2, %v946_v4, %v947_v6  ;;  %v949_v22 = vor.u32 %v947_v6, %v157_v39 }
  0xef   :  { %v521_v58 = vpop.f32.mrf.mxu2 }
  0xf0   :  { %v555_v16 = vadd.f32 %v521_v58, %v400_v20  ;;  %v1253_v20 = vrot.slane %v2576_v45, 1 }
  0xf1   :  { %v740_v23 = vpop.f32.mrf.mxu3  ;;  %v401_v42 = vpop.f32.mrf.mxu1 }
  0xf2   :  { %v774_v32 = vadd.f32 %v740_v23, %v555_v16  ;;  %v402_v19 = vadd.f32 %v401_v42, %v2350_v21  ;;  %v1254_v39 = vsel %vm935_vm2, %v1252_v50, %v1253_v20 }
  0xf3   :  { %v873_v28 = vpop.f32.mrf.mxu0 }
  0xf4   :  { %v2431_v33 = vadd.f32 %v871_v35, %v774_v32  ;;  %v1429_v35 = vrot.slane %v2167_v27, 1 }
  0xf6   :  { %v1430_v42 = vsel %vm1419_vm3, %v1427_v5, %v1429_v35 }
  0xf7   :  { %v523_v52 = vpop.f32.mrf.mxu2 }
  0xf8   :  { %v556_v62 = vadd.f32 %v523_v52, %v402_v19 }
  0xf9   :  { %v742_v21 = vpop.f32.mrf.mxu3  ;;  %v404_v48 = vpop.f32.mrf.mxu1 }
  0xfa   :  { %v775_v34 = vadd.f32 %v742_v21, %v556_v62  ;;  %v405_v24 = vadd.f32 %v404_v48, %v2357_v46  ;;  %v2577_v21 = vshrl.u32 %v2169_v29, 16  ;;  %v2578_v48 = vshll.u32 %v2172_v30, 16 }
  0xfb   :  { %v876_v37 = vpop.f32.mrf.mxu0 }
  0xfc   :  { %1048 = vmatmul.bf16.gmra.mxu1 %v948_v1  ;;  %1179 = vmatmul.bf16.gmra.mxu2 %v2138_v7  ;;  %v2447_v57 = vadd.f32 %v873_v28, %v775_v34  ;;  %v950_v7 = vrot.slane %v2574_v41, 1  ;;  %v2579_v34 = vshrl.u32 %v2167_v27, 16 }
  0xfe   :  { %1351 = vmatmul.bf16.gmra.mxu3 %v1251_v40  ;;  %1516 = vmatmul.bf16.gmra.mxu0 %v1428_v3  ;;  %v951_v16 = vsel %vm935_vm2, %v949_v22, %v950_v7  ;;  %v952_v5 = vor.u32 %v950_v7, %v2577_v21  ;;  %v1431_v40 = vrot.slane %v2324_v9, 1 }
  0xff   :  { %v526_v61 = vpop.f32.mrf.mxu2 }
 0x100   :  { %v557_v11 = vadd.f32 %v526_v61, %v405_v24  ;;  %v1255_v24 = vor.u32 %v1253_v20, %v2579_v34 }
 0x101   :  { %v745_v49 = vpop.f32.mrf.mxu3  ;;  %v406_v31 = vpop.f32.mrf.mxu1 }
 0x102   :  { %v776_v60 = vadd.f32 %v745_v49, %v557_v11  ;;  %v407_v47 = vadd.f32 %v406_v31, %v2371_v10 }
 0x103   :  { %v878_v46 = vpop.f32.mrf.mxu0 }
 0x104   :  { %v2450_v51 = vadd.f32 %v876_v37, %v776_v60 }
 0x107   :  { %v528_v38 = vpop.f32.mrf.mxu2 }
 0x108   :  { %v558_v15 = vadd.f32 %v528_v38, %v407_v47  ;;  %v957_v38 = vshll.u32 %v2362_v55, 16 }
 0x109   :  { %v747_v10 = vpop.f32.mrf.mxu3  ;;  %v409_v58 = vpop.f32.mrf.mxu1 }
 0x10a   :  { %v777_v23 = vadd.f32 %v747_v10, %v558_v15  ;;  %v410_v19 = vadd.f32 %v409_v58, %v2346_v12  ;;  %v2580_v12 = vshll.u32 %v2324_v9, 16 }
 0x10b   :  { %v881_v25 = vpop.f32.mrf.mxu0 }
 0x10c   :  { %1053 = vmatmul.bf16.gmra.mxu1 %v951_v16  ;;  %1184 = vmatmul.bf16.gmra.mxu2 %v2165_v26  ;;  %v2465_v32 = vadd.f32 %v878_v46, %v777_v23  ;;  %v953_v26 = vrot.slane %v2578_v48, 1  ;;  %v1256_v37 = vrot.slane %v2580_v12, 1  ;;  %v67_v46 = vld [vmem:[#allocation2 + $0x90] sm:$0xff]  ;;  %v959_v23 = vrot.slane %v957_v38, 1 }
 0x10d   :  { %v1090_v41 = vpack.c.bf16 %v67_v46, %v2336_v18  ;;  %v2582_v18 = vshrl.u32 %v2324_v9, 16  ;;  %v917_v48 = vpack.c.bf16 %v67_v46, %v67_v46 }
 0x10e   :  { %1356 = vmatmul.bf16.gmra.mxu3 %v1254_v39  ;;  %1521 = vmatmul.bf16.gmra.mxu0 %v1430_v42  ;;  %v954_v29 = vsel %vm935_vm2, %v952_v5, %v953_v26  ;;  %v1257_v47 = vsel %vm935_vm2, %v1255_v24, %v1256_v37  ;;  %v68_v5 = vld [vmem:[#allocation2 + $0x98] sm:$0xff] }
 0x10f   :  { %v531_v28 = vpop.f32.mrf.mxu2  ;;  %v1260_v10 = vshll.u32 %v1090_v41, 16  ;;  %v1433_v42 = vrot.slane %v1090_v41, 1 }
 0x110   :  { %v559_v4 = vadd.f32 %v531_v28, %v410_v19 }
 0x111   :  { %v750_v6 = vpop.f32.mrf.mxu3  ;;  %v411_v44 = vpop.f32.mrf.mxu1  ;;  %v1262_v39 = vrot.slane %v1260_v10, 1 }
 0x112   :  { %v778_v36 = vadd.f32 %v750_v6, %v559_v4  ;;  %v412_v1 = vadd.f32 %v411_v44, %v2353_v63  ;;  %v1432_v63 = vsel %vm1419_vm3, %v1429_v35, %v1431_v40 }
 0x113   :  { %v883_v52 = vpop.f32.mrf.mxu0 }
 0x114   :  { %v2468_v62 = vadd.f32 %v881_v25, %v778_v36 }
 0x117   :  { %v533_v3 = vpop.f32.mrf.mxu2 }
 0x118   :  { %v560_v61 = vadd.f32 %v533_v3, %v412_v1  ;;  %v1221_v1 = vpack.c.bf16 %v68_v5, %v68_v5  ;;  %v961_v3 = vshrl.u32 %v2362_v55, 16 }
 0x119   :  { %v752_v11 = vpop.f32.mrf.mxu3  ;;  %v414_v49 = vpop.f32.mrf.mxu1 }
 0x11a   :  { %v779_v31 = vadd.f32 %v752_v11, %v560_v61  ;;  %v415_v7 = vadd.f32 %v414_v49, %v2367_v54  ;;  %v1258_v54 = vor.u32 %v1256_v37, %v2582_v18  ;;  %v965_v61 = vshll.u32 %v917_v48, 16 }
 0x11b   :  { %v886_v60 = vpop.f32.mrf.mxu0  ;;  %v1264_v49 = vshrl.u32 %v1090_v41, 16  ;;  %v1435_v46 = vrot.slane %v1221_v1, 1 }
 0x11c   :  { %1058 = vmatmul.bf16.gmra.mxu1 %v954_v29  ;;  %1189 = vmatmul.bf16.gmra.mxu2 %v2167_v27  ;;  %v2484_v22 = vadd.f32 %v883_v52, %v779_v31  ;;  %v2581_v27 = vshrl.u32 %v2172_v30, 16  ;;  %v1263_v21 = vsel %vm935_vm2, %v1258_v54, %v1262_v39  ;;  %v1434_v30 = vsel %vm1419_vm3, %v1431_v40, %v1433_v42 }
 0x11d   :  { %v1268_v29 = vshll.u32 %v1221_v1, 16  ;;  %v963_v31 = vor.u32 %v961_v3, %v959_v23 }
 0x11e   :  { %1361 = vmatmul.bf16.gmra.mxu3 %v1257_v47  ;;  %1526 = vmatmul.bf16.gmra.mxu0 %v1432_v63  ;;  %v955_v16 = vor.u32 %v953_v26, %v2581_v27  ;;  %v1266_v63 = vor.u32 %v1264_v49, %v1262_v39 }
 0x11f   :  { %v536_v17 = vpop.f32.mrf.mxu2 }
 0x120   :  { %v561_v50 = vadd.f32 %v536_v17, %v415_v7  ;;  %v960_v44 = vsel %vm935_vm2, %v955_v16, %v959_v23 }
 0x121   :  { %v755_v45 = vpop.f32.mrf.mxu3  ;;  %v416_v20 = vpop.f32.mrf.mxu1 }
 0x122   :  { %v780_v15 = vadd.f32 %v755_v45, %v561_v50  ;;  %v417_v25 = vadd.f32 %v416_v20, %v2387_v53 }
 0x123   :  { %v888_v35 = vpop.f32.mrf.mxu0 }
 0x124   :  { %v2489_v58 = vadd.f32 %v886_v60, %v780_v15  ;;  %v967_v60 = vrot.slane %v965_v61, 1 }
 0x126   :  { %v968_v55 = vsel %vm935_vm2, %v963_v31, %v967_v60 }
 0x127   :  { %v538_v19 = vpop.f32.mrf.mxu2 }
 0x128   :  { %v562_v28 = vadd.f32 %v538_v19, %v417_v25 }
 0x129   :  { %v757_v4 = vpop.f32.mrf.mxu3  ;;  %v419_v6 = vpop.f32.mrf.mxu1 }
 0x12a   :  { %v781_v36 = vadd.f32 %v757_v4, %v562_v28  ;;  %v420_v26 = vadd.f32 %v419_v6, %v2348_v13  ;;  %v1270_v13 = vrot.slane %v1268_v29, 1 }
 0x12b   :  { %v891_v52 = vpop.f32.mrf.mxu0 }
 0x12c   :  { %1063 = vmatmul.bf16.gmra.mxu1 %v960_v44  ;;  %1194 = vmatmul.bf16.gmra.mxu2 %v2324_v9  ;;  %v2500_v53 = vadd.f32 %v888_v35, %v781_v36  ;;  %v1271_v15 = vsel %vm935_vm2, %v1266_v63, %v1270_v13  ;;  %v1436_v35 = vsel %vm1419_vm3, %v1433_v42, %v1435_v46 }
 0x12e   :  { %1366 = vmatmul.bf16.gmra.mxu3 %v1263_v21  ;;  %1531 = vmatmul.bf16.gmra.mxu0 %v1434_v30 }
 0x12f   :  { %v541_v34 = vpop.f32.mrf.mxu2 }
 0x130   :  { %v563_v24 = vadd.f32 %v541_v34, %v420_v26  ;;  %v2522_v26 = vld [vmem:[%s2563_s2] ss:$0 sm:$0xff]  ;;  %s2106_s2 = smov [#allocation7]  }
 0x131   :  { %v760_v12 = vpop.f32.mrf.mxu3  ;;  %v421_v37 = vpop.f32.mrf.mxu1  ;;  %s1614_s26 = sshll.u32 %s2106_s2, 4  ;;  %s1615_s26 = int_to_ptr.vmem [resolvable:$true] %s1614_s26 }
 0x132   :  { %v782_v40 = vadd.f32 %v760_v12, %v563_v24  ;;  %v422_v47 = vadd.f32 %v421_v37, %v2355_v0 }
 0x133   :  { %v893_v11 = vpop.f32.mrf.mxu0 }
 0x134   :  { %v2504_v9 = vadd.f32 %v891_v52, %v782_v40 }
 0x137   :  { %v543_v7 = vpop.f32.mrf.mxu2 }
 0x138   :  { %v564_v17 = vadd.f32 %v543_v7, %v422_v47 }
 0x139   :  { %v762_v50 = vpop.f32.mrf.mxu3  ;;  %v424_v45 = vpop.f32.mrf.mxu1 }
 0x13a   :  { %v783_v20 = vadd.f32 %v762_v50, %v564_v17  ;;  %v425_v0 = vadd.f32 %v424_v45, %v2369_v56 }
 0x13b   :  { %v896_v38 = vpop.f32.mrf.mxu0 }
 0x13c   :  { %1068 = vmatmul.bf16.gmra.mxu1 %v968_v55  ;;  %1199 = vmatmul.bf16.gmra.mxu2 %v1090_v41  ;;  %v2510_v10 = vadd.f32 %v893_v11, %v783_v20 }
 0x13e   :  { %1371 = vmatmul.bf16.gmra.mxu3 %v1271_v15  ;;  %1536 = vmatmul.bf16.gmra.mxu0 %v1436_v35 }
 0x13f   :  { %v546_v27 = vpop.f32.mrf.mxu2 }
 0x140   :  { %v565_v16 = vadd.f32 %v546_v27, %v425_v0 }
 0x141   :  { %v765_v23 = vpop.f32.mrf.mxu3  ;;  %v426_v25 = vpop.f32.mrf.mxu1 }
 0x142   :  { %v784_v18 = vadd.f32 %v765_v23, %v565_v16  ;;  %v427_v19 = vadd.f32 %v426_v25, %v2389_v14 }
 0x143   :  { %v898_v54 = vpop.f32.mrf.mxu0 }
 0x144   :  { %v2513_v39 = vadd.f32 %v896_v38, %v784_v18 }
 0x147   :  { %v548_v28 = vpop.f32.mrf.mxu2 }
 0x148   :  { %v566_v42 = vadd.f32 %v548_v28, %v427_v19 }
 0x149   :  { %v767_v4 = vpop.f32.mrf.mxu3  ;;  %v1034_v41 = vpop.f32.mrf.mxu1 }
 0x14a   :  { %v785_v6 = vadd.f32 %v767_v4, %v566_v42  ;;  %v1074_v56 = vadd.f32 %v1034_v41, %v2395_v43 }
 0x14b   :  { %v1502_v44 = vpop.f32.mrf.mxu0 }
 0x14c   :  { %v2516_v36 = vadd.f32 %v898_v54, %v785_v6 }
 0x14f   :  { %v1165_v52 = vpop.f32.mrf.mxu2 }
 0x150   :  { %v1205_v21 = vadd.f32 %v1165_v52, %v1074_v56 }
 0x151   :  { %v1337_v30 = vpop.f32.mrf.mxu3  ;;  %v1036_v5 = vpop.f32.mrf.mxu1 }
 0x152   :  { %v1377_v48 = vadd.f32 %v1337_v30, %v1205_v21  ;;  %v1075_v24 = vadd.f32 %v1036_v5, %v2410_v8 }
 0x153   :  { %v1504_v14 = vpop.f32.mrf.mxu0 }
 0x154   :  { %v1542_v1 = vadd.f32 %v1502_v44, %v1377_v48 }
 0x156   :  { %v1562_v34 = vadd.f32 %v2522_v26, %v1542_v1 }
 0x157   :  { %v1167_v12 = vpop.f32.mrf.mxu2 }
 0x158   :  { %v1578_v37 = vmax.f32 %v1562_v34, 0.0  ;;  %v1206_v3 = vadd.f32 %v1167_v12, %v1075_v24 }
 0x159   :  { %v1339_v43 = vpop.f32.mrf.mxu3  ;;  %v1039_v61 = vpop.f32.mrf.mxu1 }
 0x15a   :  { %1594 = vst [vmem:[#allocation7] sm:$0xff] %v1578_v37  ;;  %v1378_v40 = vadd.f32 %v1339_v43, %v1206_v3  ;;  %v1076_v31 = vadd.f32 %v1039_v61, %v2412_v59 }
 0x15b   :  { %v1507_v11 = vpop.f32.mrf.mxu0 }
 0x15c   :  { %v1543_v49 = vadd.f32 %v1504_v14, %v1378_v40 }
 0x15e   :  { %v1563_v29 = vadd.f32 %v2522_v26, %v1543_v49 }
 0x15f   :  { %v1170_v60 = vpop.f32.mrf.mxu2 }
 0x160   :  { %v1579_v47 = vmax.f32 %v1563_v29, 0.0  ;;  %v1207_v63 = vadd.f32 %v1170_v60, %v1076_v31 }
 0x161   :  { %v1342_v13 = vpop.f32.mrf.mxu3  ;;  %v1041_v46 = vpop.f32.mrf.mxu1 }
 0x162   :  { %1595 = vst [vmem:[#allocation7 + $0x8] sm:$0xff] %v1579_v47  ;;  %v1379_v8 = vadd.f32 %v1342_v13, %v1207_v63  ;;  %v1077_v45 = vadd.f32 %v1041_v46, %v2428_v2 }
 0x163   :  { %v1509_v7 = vpop.f32.mrf.mxu0 }
 0x164   :  { %v1544_v17 = vadd.f32 %v1507_v11, %v1379_v8 }
 0x166   :  { %v1564_v50 = vadd.f32 %v2522_v26, %v1544_v17 }
 0x167   :  { %v1172_v55 = vpop.f32.mrf.mxu2 }
 0x168   :  { %v1580_v20 = vmax.f32 %v1564_v50, 0.0  ;;  %v1208_v38 = vadd.f32 %v1172_v55, %v1077_v45 }
 0x169   :  { %v1344_v15 = vpop.f32.mrf.mxu3  ;;  %v1044_v35 = vpop.f32.mrf.mxu1 }
 0x16a   :  { %1596 = vst [vmem:[#allocation7 + $0x10] sm:$0xff] %v1580_v20  ;;  %v1380_v59 = vadd.f32 %v1344_v15, %v1208_v38  ;;  %v1078_v23 = vadd.f32 %v1044_v35, %v2431_v33 }
 0x16b   :  { %v1512_v0 = vpop.f32.mrf.mxu0 }
 0x16c   :  { %v1545_v27 = vadd.f32 %v1509_v7, %v1380_v59 }
 0x16e   :  { %v1565_v16 = vadd.f32 %v2522_v26, %v1545_v27 }
 0x16f   :  { %v1175_v25 = vpop.f32.mrf.mxu2 }
 0x170   :  { %v1581_v18 = vmax.f32 %v1565_v16, 0.0  ;;  %v1209_v54 = vadd.f32 %v1175_v25, %v1078_v23 }
 0x171   :  { %v1347_v19 = vpop.f32.mrf.mxu3  ;;  %v1046_v28 = vpop.f32.mrf.mxu1 }
 0x172   :  { %1597 = vst [vmem:[#allocation7 + $0x18] sm:$0xff] %v1581_v18  ;;  %v1381_v2 = vadd.f32 %v1347_v19, %v1209_v54  ;;  %v1079_v6 = vadd.f32 %v1046_v28, %v2447_v57 }
 0x173   :  { %v1514_v42 = vpop.f32.mrf.mxu0 }
 0x174   :  { %v1546_v4 = vadd.f32 %v1512_v0, %v1381_v2 }
 0x176   :  { %v1566_v41 = vadd.f32 %v2522_v26, %v1546_v4 }
 0x177   :  { %v1177_v44 = vpop.f32.mrf.mxu2 }
 0x178   :  { %v1582_v56 = vmax.f32 %v1566_v41, 0.0  ;;  %v1210_v52 = vadd.f32 %v1177_v44, %v1079_v6 }
 0x179   :  { %v1349_v21 = vpop.f32.mrf.mxu3  ;;  %v1049_v30 = vpop.f32.mrf.mxu1 }
 0x17a   :  { %1598 = vst [vmem:[#allocation7 + $0x20] sm:$0xff] %v1582_v56  ;;  %v1382_v33 = vadd.f32 %v1349_v21, %v1210_v52  ;;  %v1080_v1 = vadd.f32 %v1049_v30, %v2450_v51 }
 0x17b   :  { %v1517_v5 = vpop.f32.mrf.mxu0 }
 0x17c   :  { %v1547_v48 = vadd.f32 %v1514_v42, %v1382_v33 }
 0x17e   :  { %v1567_v14 = vadd.f32 %v2522_v26, %v1547_v48 }
 0x17f   :  { %v1180_v34 = vpop.f32.mrf.mxu2 }
 0x180   :  { %v1583_v24 = vmax.f32 %v1567_v14, 0.0  ;;  %v1211_v12 = vadd.f32 %v1180_v34, %v1080_v1 }
 0x181   :  { %v1352_v37 = vpop.f32.mrf.mxu3  ;;  %v1051_v3 = vpop.f32.mrf.mxu1 }
 0x182   :  { %1599 = vst [vmem:[#allocation7 + $0x28] sm:$0xff] %v1583_v24  ;;  %v1383_v57 = vadd.f32 %v1352_v37, %v1211_v12  ;;  %v1081_v11 = vadd.f32 %v1051_v3, %v2465_v32 }
 0x183   :  { %v1519_v43 = vpop.f32.mrf.mxu0 }
 0x184   :  { %v1548_v61 = vadd.f32 %v1517_v5, %v1383_v57 }
 0x186   :  { %v1568_v40 = vadd.f32 %v2522_v26, %v1548_v61 }
 0x187   :  { %v1182_v49 = vpop.f32.mrf.mxu2 }
 0x188   :  { %v1584_v29 = vmax.f32 %v1568_v40, 0.0  ;;  %v1212_v31 = vadd.f32 %v1182_v49, %v1081_v11 }
 0x189   :  { %v1354_v60 = vpop.f32.mrf.mxu3  ;;  %v1054_v47 = vpop.f32.mrf.mxu1 }
 0x18a   :  { %1600 = vst [vmem:[#allocation7 + $0x30] sm:$0xff] %v1584_v29  ;;  %v1384_v51 = vadd.f32 %v1354_v60, %v1212_v31  ;;  %v1082_v8 = vadd.f32 %v1054_v47, %v2468_v62 }
 0x18b   :  { %v1522_v63 = vpop.f32.mrf.mxu0 }
 0x18c   :  { %v1549_v13 = vadd.f32 %v1519_v43, %v1384_v51 }
 0x18e   :  { %v1569_v46 = vadd.f32 %v2522_v26, %v1549_v13 }
 0x18f   :  { %v1185_v7 = vpop.f32.mrf.mxu2 }
 0x190   :  { %v1585_v17 = vmax.f32 %v1569_v46, 0.0  ;;  %v1213_v50 = vadd.f32 %v1185_v7, %v1082_v8 }
 0x191   :  { %v1357_v45 = vpop.f32.mrf.mxu3  ;;  %v1056_v55 = vpop.f32.mrf.mxu1 }
 0x192   :  { %1601 = vst [vmem:[#allocation7 + $0x38] sm:$0xff] %v1585_v17  ;;  %v1385_v32 = vadd.f32 %v1357_v45, %v1213_v50  ;;  %v1083_v35 = vadd.f32 %v1056_v55, %v2484_v22 }
 0x193   :  { %v1524_v20 = vpop.f32.mrf.mxu0 }
 0x194   :  { %v1550_v38 = vadd.f32 %v1522_v63, %v1385_v32 }
 0x196   :  { %v1570_v15 = vadd.f32 %v2522_v26, %v1550_v38 }
 0x197   :  { %v1187_v59 = vpop.f32.mrf.mxu2 }
 0x198   :  { %v1586_v0 = vmax.f32 %v1570_v15, 0.0  ;;  %v1214_v27 = vadd.f32 %v1187_v59, %v1083_v35 }
 0x199   :  { %v1359_v16 = vpop.f32.mrf.mxu3  ;;  %v1059_v23 = vpop.f32.mrf.mxu1 }
 0x19a   :  { %1602 = vst [vmem:[#allocation7 + $0x40] sm:$0xff] %v1586_v0  ;;  %v1386_v62 = vadd.f32 %v1359_v16, %v1214_v27  ;;  %v1084_v19 = vadd.f32 %v1059_v23, %v2489_v58 }
 0x19b   :  { %v1527_v25 = vpop.f32.mrf.mxu0 }
 0x19c   :  { %v1551_v18 = vadd.f32 %v1524_v20, %v1386_v62 }
 0x19e   :  { %v1571_v54 = vadd.f32 %v2522_v26, %v1551_v18 }
 0x19f   :  { %v1190_v28 = vpop.f32.mrf.mxu2 }
 0x1a0   :  { %v1587_v2 = vmax.f32 %v1571_v54, 0.0  ;;  %v1215_v42 = vadd.f32 %v1190_v28, %v1084_v19 }
 0x1a1   :  { %v1362_v4 = vpop.f32.mrf.mxu3  ;;  %v1061_v41 = vpop.f32.mrf.mxu1 }
 0x1a2   :  { %1603 = vst [vmem:[#allocation7 + $0x48] sm:$0xff] %v1587_v2  ;;  %v1387_v22 = vadd.f32 %v1362_v4, %v1215_v42  ;;  %v1085_v52 = vadd.f32 %v1061_v41, %v2500_v53 }
 0x1a3   :  { %v1529_v6 = vpop.f32.mrf.mxu0 }
 0x1a4   :  { %v1552_v44 = vadd.f32 %v1527_v25, %v1387_v22 }
 0x1a6   :  { %v1572_v56 = vadd.f32 %v2522_v26, %v1552_v44 }
 0x1a7   :  { %v1192_v21 = vpop.f32.mrf.mxu2 }
 0x1a8   :  { %v1588_v30 = vmax.f32 %v1572_v56, 0.0  ;;  %v1216_v33 = vadd.f32 %v1192_v21, %v1085_v52 }
 0x1a9   :  { %v1364_v5 = vpop.f32.mrf.mxu3  ;;  %v1064_v48 = vpop.f32.mrf.mxu1 }
 0x1aa   :  { %1604 = vst [vmem:[#allocation7 + $0x50] sm:$0xff] %v1588_v30  ;;  %v1388_v58 = vadd.f32 %v1364_v5, %v1216_v33  ;;  %v1086_v24 = vadd.f32 %v1064_v48, %v2504_v9 }
 0x1ab   :  { %v1532_v1 = vpop.f32.mrf.mxu0 }
 0x1ac   :  { %v1553_v14 = vadd.f32 %v1529_v6, %v1388_v58 }
 0x1ae   :  { %v1573_v34 = vadd.f32 %v2522_v26, %v1553_v14 }
 0x1af   :  { %v1195_v12 = vpop.f32.mrf.mxu2 }
 0x1b0   :  { %v1589_v37 = vmax.f32 %v1573_v34, 0.0  ;;  %v1217_v3 = vadd.f32 %v1195_v12, %v1086_v24 }
 0x1b1   :  { %v1367_v57 = vpop.f32.mrf.mxu3  ;;  %v1066_v43 = vpop.f32.mrf.mxu1 }
 0x1b2   :  { %1605 = vst [vmem:[#allocation7 + $0x58] sm:$0xff] %v1589_v37  ;;  %v1389_v53 = vadd.f32 %v1367_v57, %v1217_v3  ;;  %v1087_v11 = vadd.f32 %v1066_v43, %v2510_v10 }
 0x1b3   :  { %v1534_v49 = vpop.f32.mrf.mxu0 }
 0x1b4   :  { %v1554_v61 = vadd.f32 %v1532_v1, %v1389_v53 }
 0x1b6   :  { %v1574_v40 = vadd.f32 %v2522_v26, %v1554_v61 }
 0x1b7   :  { %v1197_v29 = vpop.f32.mrf.mxu2 }
 0x1b8   :  { %v1590_v31 = vmax.f32 %v1574_v40, 0.0  ;;  %v1218_v60 = vadd.f32 %v1197_v29, %v1087_v11 }
 0x1b9   :  { %v1369_v47 = vpop.f32.mrf.mxu3  ;;  %v1069_v51 = vpop.f32.mrf.mxu1 }
 0x1ba   :  { %1606 = vst [vmem:[#allocation7 + $0x60] sm:$0xff] %v1590_v31  ;;  %v1390_v9 = vadd.f32 %v1369_v47, %v1218_v60  ;;  %v1088_v46 = vadd.f32 %v1069_v51, %v2513_v39 }
 0x1bb   :  { %v1537_v45 = vpop.f32.mrf.mxu0 }
 0x1bc   :  { %v1555_v63 = vadd.f32 %v1534_v49, %v1390_v9 }
 0x1be   :  { %v1575_v13 = vadd.f32 %v2522_v26, %v1555_v63 }
 0x1bf   :  { %v1200_v8 = vpop.f32.mrf.mxu2 }
 0x1c0   :  { %v1591_v7 = vmax.f32 %v1575_v13, 0.0  ;;  %v1219_v17 = vadd.f32 %v1200_v8, %v1088_v46 }
 0x1c1   :  { %v1372_v50 = vpop.f32.mrf.mxu3  ;;  %v1071_v55 = vpop.f32.mrf.mxu1 }
 0x1c2   :  { %1607 = vst [vmem:[#allocation7 + $0x68] sm:$0xff] %v1591_v7  ;;  %v1391_v10 = vadd.f32 %v1372_v50, %v1219_v17  ;;  %v1089_v38 = vadd.f32 %v1071_v55, %v2516_v36 }
 0x1c3   :  { %v1539_v39 = vpop.f32.mrf.mxu0 }
 0x1c4   :  { %v1556_v32 = vadd.f32 %v1537_v45, %v1391_v10 }
 0x1c6   :  { %v1576_v20 = vadd.f32 %v2522_v26, %v1556_v32 }
 0x1c7   :  { %v1202_v15 = vpop.f32.mrf.mxu2 }
 0x1c8   :  { %v1592_v35 = vmax.f32 %v1576_v20, 0.0  ;;  %v1220_v59 = vadd.f32 %v1202_v15, %v1089_v38 }
 0x1c9   :  { %v1374_v0 = vpop.f32.mrf.mxu3 }
 0x1ca   :  { %1608 = vst [vmem:[#allocation7 + $0x70] sm:$0xff] %v1592_v35  ;;  %v1392_v27 = vadd.f32 %v1374_v0, %v1220_v59 }
 0x1cc   :  { %v1557_v16 = vadd.f32 %v1539_v39, %v1392_v27 }
 0x1ce   :  { %v1577_v23 = vadd.f32 %v2522_v26, %v1557_v16 }
 0x1d0   :  { %v1593_v62 = vmax.f32 %v1577_v23, 0.0 }
 0x1d2   :  { %1609 = vst [vmem:[#allocation7 + $0x78] sm:$0xff] %v1593_v62 }
 0x1d3   :  { %1622 = dma.vmem_to_hbm [thread:$0]  %s1615_s26, 2048, %s1617_s29, [#allocation4], %s2101_s20, %s2101_s20, %s2102_s21  }
 0x1d4   :  { %2098 = dma.done.wait [#allocation4], 2048  }
 0x1d5   :  { %2099 = vsyncadd [#allocation4], 4294965248 }
 0x1d6   :  { %1627 = vsyncpa [#allocation3], 1 }
 0x1d7   :  { %1628 = vsyncpa [#allocation6], 1 }
 0x1d8   :  { %1629 = vsyncpa [#allocation4], 1 }

</bundles_post_ra>
